<compile_context>
chip_gen: v5e
topology: v5e:2x2
jax: 0.10.0
libtpu: 0.0.40
codegen_flags: <defaults>
</compile_context>

<pallas_src>
import functools
import math

import jax
import jax.numpy as jnp
from jax import lax
from jax.experimental import pallas as pl
from jax.experimental.pallas import tpu as pltpu


# ----------------------------- Pallas kernel -------------------------------

def _encoder_layer_kernel(
    x_ref,                              # (N, D)   N = TB * S flattened rows
    ln1_g_ref, ln1_b_ref,               # (1, D)
    wqkv_ref, bqkv_ref,                 # (D, 3D), (1, 3D)   Q third pre-scaled
    wo_ref, bo_ref,                     # (D, D), (1, D)
    ln2_g_ref, ln2_b_ref,               # (1, D)
    w1_ref, b1_ref,                     # (D, F), (1, F)
    w2_ref, b2_ref,                     # (F, D), (1, D)
    o_ref,                              # (N, D)
    attn_scr,                           # VMEM scratch (N, D) f32
    *,
    seq_len: int,
    num_heads: int,
    mxu_dtype,
):
    eps = 1e-5
    x = x_ref[...].astype(jnp.float32)                       # (N, D)
    N, D = x.shape
    S = seq_len
    TB = N // S
    H = num_heads
    dh = D // H

    def layer_norm(v, g_ref, b_ref):
        mu = jnp.mean(v, axis=-1, keepdims=True)
        c = v - mu
        var = jnp.mean(c * c, axis=-1, keepdims=True)
        return c * lax.rsqrt(var + eps) * g_ref[0] + b_ref[0]

    def mm(a, b):
        return jnp.dot(a.astype(mxu_dtype), b.astype(mxu_dtype),
                       preferred_element_type=jnp.float32)

    def bmm(eq, a, b):
        return jnp.einsum(eq, a.astype(mxu_dtype), b.astype(mxu_dtype),
                          preferred_element_type=jnp.float32)

    # ---- pre-LN + fused QKV projection (single lane-dense matmul) -----------
    xn = layer_norm(x, ln1_g_ref, ln1_b_ref)                  # (N, D)
    qkv = mm(xn, wqkv_ref[...]) + bqkv_ref[0]                 # (N, 3D), Q scaled

    # ---- multi-head self-attention: heads split only at the (S,S) stage -----
    for h in range(H):
        qh = qkv[:, h * dh:(h + 1) * dh].reshape(TB, S, dh)
        kh = qkv[:, D + h * dh:D + (h + 1) * dh].reshape(TB, S, dh)
        vh = qkv[:, 2 * D + h * dh:2 * D + (h + 1) * dh].reshape(TB, S, dh)

        logits = bmm('bqd,bkd->bqk', qh, kh)                  # (TB, S, S)
        m = jnp.max(logits, axis=-1, keepdims=True)
        p = jnp.exp(logits - m)
        p = p * pl.reciprocal(jnp.sum(p, axis=-1, keepdims=True), approx=False)

        ah = bmm('bqk,bkd->bqd', p, vh)                       # (TB, S, dh)
        # lane-packed head concat: write this head's dh columns of the scratch
        attn_scr[:, h * dh:(h + 1) * dh] = ah.reshape(N, dh)

    # single lane-dense output projection (the head concat is the scratch layout)
    attn = mm(attn_scr[...], wo_ref[...]) + bo_ref[0]         # (N, D)
    # dropout: identity (eval mode)

    # ---- pre-LN + feed-forward ----------------------------------------------
    yn = layer_norm(attn, ln2_g_ref, ln2_b_ref)               # (N, D)
    h1 = mm(yn, w1_ref[...]) + b1_ref[0]                      # (N, F)
    # exact GELU (nn.GELU default): 0.5 * x * (1 + erf(x / sqrt(2)))
    h1 = 0.5 * h1 * (1.0 + lax.erf(h1 * (1.0 / math.sqrt(2.0))))
    out = mm(h1, w2_ref[...]) + b2_ref[0]                     # (N, D)
    # dropout / dropout2: identity (eval mode)

    o_ref[...] = out.astype(o_ref.dtype)


# ------------------------------- wrapper ------------------------------------

def _device_tuning():
    try:
        kind = jax.devices()[0].device_kind.lower()
    except Exception:
        kind = ""
    if "v7" in kind:
        # 2 TensorCores sharing 64 MiB VMEM: even grid length so both TCs get
        # equal work each wave, smaller row blocks, tighter VMEM cap.
        return {"target_rows": 256, "even_grid": True, "vmem_cap": 48 * 2**20}
    # v5e / v6e: single TensorCore, 128 MiB VMEM -> fewer, fatter row blocks.
    return {"target_rows": 512, "even_grid": False, "vmem_cap": 96 * 2**20}


def _pick_batch_block(batch, seq, *, target_rows, even_grid):
    """Largest divisor of `batch` with TB*S near the MXU sweet spot, keeping
    TB*S a multiple of 8 (the (8,128) rule) and, on v7x, an even grid."""
    divisors = [d for d in range(1, batch + 1) if batch % d == 0]
    cands = [d for d in divisors if d * seq <= target_rows] or [1]
    if even_grid:
        ev = [d for d in cands if (batch // d) % 2 == 0]
        if ev:
            cands = ev
    rows_ok = [d for d in cands if (d * seq) % 8 == 0]
    if rows_ok:
        return max(rows_ok)
    # single full-array block (block_shape == array shape) is always layout-legal
    return batch


def _vmem_limit_bytes(N, D, F, weight_itemsize, single_buffer_weights, cap):
    """Rough residency estimate -> vmem_limit_bytes (review: derive, not guess)."""
    def padded(r, c):
        return (-(-r // 8) * 8) * (-(-c // 128) * 128)
    wbuf = 1 if single_buffer_weights else 2
    weights = (padded(D, 3 * D) + padded(D, D) + padded(D, F) + padded(F, D)) \
        * weight_itemsize * wbuf
    smalls = 9 * padded(8, max(3 * D, F)) * 4 * wbuf     # LN params + biases
    io = 4 * padded(N, D) * 4                            # double-buffered x, out
    scratch = padded(N, D) * 4                           # head-concat scratch
    live = 6 * padded(N, max(3 * D, F)) * 4              # f32 temporaries headroom
    est = weights + smalls + io + scratch + live
    return int(min(cap, max(32 * 2**20, 2 * est)))


def encoder_layer(x, params, *, num_heads, batch_block=None,
                  mxu_dtype=jnp.bfloat16):
    """EncoderLayer forward.  mxu_dtype=bf16 is the production default
    (~3-4x MXU throughput); pass jnp.float32 for exact-math comparisons."""
    B, S, D = x.shape
    F = params["w1"].shape[1]
    H = num_heads
    assert D % H == 0
    dh = D // H
    scale = 1.0 / math.sqrt(dh)

    tune = _device_tuning()
    TB = batch_block if batch_block is not None else _pick_batch_block(
        B, S, target_rows=tune["target_rows"], even_grid=tune["even_grid"])
    assert B % TB == 0, "batch block must divide batch"
    N = TB * S
    assert N % 8 == 0 or TB == B, "row block must be a multiple of 8 rows"

    w_dt = jnp.dtype(mxu_dtype)
    # Fold 1/sqrt(dh) into the Q third of the fused lane-dense QKV weight/bias.
    col_scale = jnp.concatenate([jnp.full((D,), scale, jnp.float32),
                                 jnp.ones((2 * D,), jnp.float32)])
    wqkv = (params["wqkv"] * col_scale[None, :]).astype(w_dt)
    bqkv = (params["bqkv"] * col_scale[None, :]).astype(jnp.float32)
    wo = params["wo"].astype(w_dt)
    w1 = params["w1"].astype(w_dt)
    w2 = params["w2"].astype(w_dt)

    # flatten rows so every matmul sees a (TB*S, D) slab
    x2 = x.reshape(B * S, D)

    kernel = functools.partial(_encoder_layer_kernel,
                               seq_len=S, num_heads=H, mxu_dtype=w_dt)

    def call(single_buffer_weights):
        def wspec(shape):
            nd = len(shape)
            imap = lambda i, _nd=nd: (0,) * _nd
            if single_buffer_weights:
                # constant index_map -> block never re-fetched; 1 buffer is enough
                return pl.BlockSpec(shape, imap, pipeline_mode=pl.Buffered(1))
            return pl.BlockSpec(shape, imap)

        in_specs = [
            pl.BlockSpec((N, D), lambda i: (i, 0)),          # x rows
            wspec((1, D)), wspec((1, D)),                    # ln1 gamma/beta
            wspec((D, 3 * D)), wspec((1, 3 * D)),            # fused QKV w, b
            wspec((D, D)), wspec((1, D)),                    # out proj w, b
            wspec((1, D)), wspec((1, D)),                    # ln2 gamma/beta
            wspec((D, F)), wspec((1, F)),                    # linear1
            wspec((F, D)), wspec((1, D)),                    # linear2
        ]
        out = pl.pallas_call(
            kernel,
            out_shape=jax.ShapeDtypeStruct((B * S, D), x.dtype),
            grid_spec=pltpu.PrefetchScalarGridSpec(
                num_scalar_prefetch=0,
                grid=(B // TB,),
                in_specs=in_specs,
                out_specs=pl.BlockSpec((N, D), lambda i: (i, 0)),
                scratch_shapes=[pltpu.VMEM((N, D), jnp.float32)],
            ),
            compiler_params=pltpu.CompilerParams(
                dimension_semantics=("parallel",),
                vmem_limit_bytes=_vmem_limit_bytes(
                    N, D, F, w_dt.itemsize, single_buffer_weights,
                    tune["vmem_cap"]),
            ),
        )(
            x2,
            params["ln1_g"], params["ln1_b"],
            wqkv, bqkv,
            wo, params["bo"],
            params["ln2_g"], params["ln2_b"],
            w1, params["b1"],
            w2, params["b2"],
        )
        return jax.block_until_ready(out)   # surface compile/runtime errors here

    try:
        out2 = call(True)
    except Exception:
        # pl.Buffered(1) unsupported on this jax/libtpu -> default double buffering
        out2 = call(False)
    return out2.reshape(B, S, D)


# --------------------------- pure-JAX reference ------------------------------

def encoder_layer_ref(x, params, *, num_heads):
    eps = 1e-5
    B, S, D = x.shape
    dh = D // num_heads
    scale = 1.0 / math.sqrt(dh)

    def ln(v, g, b):
        mu = jnp.mean(v, axis=-1, keepdims=True)
        var = jnp.mean((v - mu) ** 2, axis=-1, keepdims=True)
        return (v - mu) / jnp.sqrt(var + eps) * g[0] + b[0]

    xn = ln(x, params["ln1_g"], params["ln1_b"])
    qkv = xn @ params["wqkv"] + params["bqkv"][0]
    q, k, v = qkv[..., :D], qkv[..., D:2 * D], qkv[..., 2 * D:]

    def split(t):  # (B,S,D) -> (B,H,S,dh)
        return t.reshape(B, S, num_heads, dh).transpose(0, 2, 1, 3)

    qh, kh, vh = split(q), split(k), split(v)
    logits = jnp.einsum("bhqd,bhkd->bhqk", qh, kh) * scale
    p = jax.nn.softmax(logits, axis=-1)
    attn = jnp.einsum("bhqk,bhkd->bhqd", p, vh)
    attn = attn.transpose(0, 2, 1, 3).reshape(B, S, D)
    attn = attn @ params["wo"] + params["bo"][0]

    yn = ln(attn, params["ln2_g"], params["ln2_b"])
    h1 = yn @ params["w1"] + params["b1"][0]
    h1 = 0.5 * h1 * (1.0 + lax.erf(h1 / math.sqrt(2.0)))
    return h1 @ params["w2"] + params["b2"][0]


# --------------------------------- main --------------------------------------

if __name__ == "__main__":
    B, S, D, H, F = 2, 8, 32, 4, 64

    key = jax.random.PRNGKey(0)
    keys = jax.random.split(key, 12)

    params = {
        "ln1_g": (1.0 + 0.05 * jax.random.normal(keys[0], (1, D))).astype(jnp.float32),
        "ln1_b": (0.05 * jax.random.normal(keys[1], (1, D))).astype(jnp.float32),
        # stored pre-transposed: y = x @ W^T  <=>  x @ wqkv  with wqkv = W^T
        "wqkv": (0.1 * jax.random.normal(keys[2], (D, 3 * D))).astype(jnp.float32),
        "bqkv": (0.05 * jax.random.normal(keys[3], (1, 3 * D))).astype(jnp.float32),
        "wo": (0.1 * jax.random.normal(keys[4], (D, D))).astype(jnp.float32),
        "bo": (0.05 * jax.random.normal(keys[5], (1, D))).astype(jnp.float32),
        "ln2_g": (1.0 + 0.05 * jax.random.normal(keys[6], (1, D))).astype(jnp.float32),
        "ln2_b": (0.05 * jax.random.normal(keys[7], (1, D))).astype(jnp.float32),
        "w1": (0.1 * jax.random.normal(keys[8], (D, F))).astype(jnp.float32),
        "b1": (0.05 * jax.random.normal(keys[9], (1, F))).astype(jnp.float32),
        "w2": (0.1 * jax.random.normal(keys[10], (F, D))).astype(jnp.float32),
        "b2": (0.05 * jax.random.normal(keys[11], (1, D))).astype(jnp.float32),
    }

    x = jax.random.normal(jax.random.PRNGKey(42), (B, S, D), dtype=jnp.float32)

    ref = encoder_layer_ref(x, params, num_heads=H)

    # exact-math path (f32 MXU operands): tight tolerance vs. the reference
    out_f32 = jax.block_until_ready(
        encoder_layer(x, params, num_heads=H, mxu_dtype=jnp.float32))
    assert out_f32.shape == (B, S, D)
    err32 = jnp.max(jnp.abs(out_f32 - ref))
    assert jnp.allclose(out_f32, ref, atol=1e-4, rtol=1e-4), f"f32 max abs err = {err32}"

    # production default (bf16 MXU operands, f32 accumulate): looser tolerance
    out_bf16 = jax.block_until_ready(encoder_layer(x, params, num_heads=H))
    errbf = jnp.max(jnp.abs(out_bf16 - ref))
    assert jnp.allclose(out_bf16, ref, atol=5e-2, rtol=5e-2), f"bf16 max abs err = {errbf}"

    print("KERNEL_OK")
</pallas_src>

<mosaic_0001>
module attributes {stable_mosaic.version = 11 : i64} {
  func.func @_encoder_layer_kernel(%arg0: i32, %arg1: memref<16x32xf32, #tpu.memory_space<vmem>>, %arg2: memref<1x32xf32, #tpu.memory_space<vmem>>, %arg3: memref<1x32xf32, #tpu.memory_space<vmem>>, %arg4: memref<32x96xf32, #tpu.memory_space<vmem>>, %arg5: memref<1x96xf32, #tpu.memory_space<vmem>>, %arg6: memref<32x32xf32, #tpu.memory_space<vmem>>, %arg7: memref<1x32xf32, #tpu.memory_space<vmem>>, %arg8: memref<1x32xf32, #tpu.memory_space<vmem>>, %arg9: memref<1x32xf32, #tpu.memory_space<vmem>>, %arg10: memref<32x64xf32, #tpu.memory_space<vmem>>, %arg11: memref<1x64xf32, #tpu.memory_space<vmem>>, %arg12: memref<64x32xf32, #tpu.memory_space<vmem>>, %arg13: memref<1x32xf32, #tpu.memory_space<vmem>>, %arg14: memref<16x32xf32, #tpu.memory_space<vmem>>, %arg15: memref<16x32xf32, #tpu.memory_space<vmem>>) attributes {dimension_semantics = [#tpu.dimension_semantics<parallel>], iteration_bounds = array<i64: 1>, scalar_prefetch = 0 : i64, scratch_operands = 1 : i64, tpu.core_type = #tpu.core_type<tc>, window_params = [{transform_indices = @transform_0, window_bounds = array<i64: 16, 32>}, {pipeline_mode = #tpu.pipeline_mode<synchronous>, transform_indices = @transform_1, window_bounds = array<i64: 1, 32>}, {pipeline_mode = #tpu.pipeline_mode<synchronous>, transform_indices = @transform_2, window_bounds = array<i64: 1, 32>}, {pipeline_mode = #tpu.pipeline_mode<synchronous>, transform_indices = @transform_3, window_bounds = array<i64: 32, 96>}, {pipeline_mode = #tpu.pipeline_mode<synchronous>, transform_indices = @transform_4, window_bounds = array<i64: 1, 96>}, {pipeline_mode = #tpu.pipeline_mode<synchronous>, transform_indices = @transform_5, window_bounds = array<i64: 32, 32>}, {pipeline_mode = #tpu.pipeline_mode<synchronous>, transform_indices = @transform_6, window_bounds = array<i64: 1, 32>}, {pipeline_mode = #tpu.pipeline_mode<synchronous>, transform_indices = @transform_7, window_bounds = array<i64: 1, 32>}, {pipeline_mode = #tpu.pipeline_mode<synchronous>, transform_indices = @transform_8, window_bounds = array<i64: 1, 32>}, {pipeline_mode = #tpu.pipeline_mode<synchronous>, transform_indices = @transform_9, window_bounds = array<i64: 32, 64>}, {pipeline_mode = #tpu.pipeline_mode<synchronous>, transform_indices = @transform_10, window_bounds = array<i64: 1, 64>}, {pipeline_mode = #tpu.pipeline_mode<synchronous>, transform_indices = @transform_11, window_bounds = array<i64: 64, 32>}, {pipeline_mode = #tpu.pipeline_mode<synchronous>, transform_indices = @transform_12, window_bounds = array<i64: 1, 32>}, {transform_indices = @transform_13, window_bounds = array<i64: 16, 32>}]} {
    %c0 = arith.constant 0 : index
    %c0_0 = arith.constant 0 : index
    %0 = vector.load %arg1[%c0, %c0_0] : memref<16x32xf32, #tpu.memory_space<vmem>>, vector<16x32xf32>
    %cst = arith.constant dense<0.000000e+00> : vector<16xf32>
    %1 = vector.multi_reduction <add>, %0, %cst [1] : vector<16x32xf32> to vector<16xf32>
    %2 = vector.shape_cast %1 : vector<16xf32> to vector<16x1xf32>
    %cst_1 = arith.constant 3.200000e+01 : f32
    %3 = vector.broadcast %cst_1 : f32 to vector<16x1xf32>
    %4 = arith.divf %2, %3 : vector<16x1xf32>
    %5 = vector.broadcast %4 : vector<16x1xf32> to vector<16x32xf32>
    %6 = arith.subf %0, %5 : vector<16x32xf32>
    %7 = arith.mulf %6, %6 : vector<16x32xf32>
    %cst_2 = arith.constant dense<0.000000e+00> : vector<16xf32>
    %8 = vector.multi_reduction <add>, %7, %cst_2 [1] : vector<16x32xf32> to vector<16xf32>
    %9 = vector.shape_cast %8 : vector<16xf32> to vector<16x1xf32>
    %cst_3 = arith.constant 3.200000e+01 : f32
    %10 = vector.broadcast %cst_3 : f32 to vector<16x1xf32>
    %11 = arith.divf %9, %10 : vector<16x1xf32>
    %cst_4 = arith.constant 9.99999974E-6 : f32
    %12 = vector.broadcast %cst_4 : f32 to vector<16x1xf32>
    %13 = arith.addf %11, %12 : vector<16x1xf32>
    %14 = math.rsqrt %13 : vector<16x1xf32>
    %15 = vector.broadcast %14 : vector<16x1xf32> to vector<16x32xf32>
    %16 = arith.mulf %6, %15 : vector<16x32xf32>
    %c0_5 = arith.constant 0 : index
    %c0_6 = arith.constant 0 : index
    %17 = vector.load %arg2[%c0_5, %c0_6] : memref<1x32xf32, #tpu.memory_space<vmem>>, vector<1x32xf32>
    %18 = vector.shape_cast %17 : vector<1x32xf32> to vector<32xf32>
    %19 = vector.shape_cast %18 : vector<32xf32> to vector<1x32xf32>
    %20 = vector.broadcast %19 : vector<1x32xf32> to vector<16x32xf32>
    %21 = arith.mulf %16, %20 : vector<16x32xf32>
    %c0_7 = arith.constant 0 : index
    %c0_8 = arith.constant 0 : index
    %22 = vector.load %arg3[%c0_7, %c0_8] : memref<1x32xf32, #tpu.memory_space<vmem>>, vector<1x32xf32>
    %23 = vector.shape_cast %22 : vector<1x32xf32> to vector<32xf32>
    %24 = vector.shape_cast %23 : vector<32xf32> to vector<1x32xf32>
    %25 = vector.broadcast %24 : vector<1x32xf32> to vector<16x32xf32>
    %26 = arith.addf %21, %25 : vector<16x32xf32>
    %c0_9 = arith.constant 0 : index
    %c0_10 = arith.constant 0 : index
    %27 = vector.load %arg4[%c0_9, %c0_10] : memref<32x96xf32, #tpu.memory_space<vmem>>, vector<32x96xf32>
    %cst_11 = arith.constant dense<0.000000e+00> : vector<16x96xf32>
    %28 = tpu.matmul %26, %27, %cst_11 {dimension_numbers = #tpu.dot_dimension_numbers<[1], [0], [0], [1], [0, 0, 1, 1], [], []>} : vector<16x32xf32>, vector<32x96xf32>, vector<16x96xf32> -> vector<16x96xf32>
    %c0_12 = arith.constant 0 : index
    %c0_13 = arith.constant 0 : index
    %29 = vector.load %arg5[%c0_12, %c0_13] : memref<1x96xf32, #tpu.memory_space<vmem>>, vector<1x96xf32>
    %30 = vector.shape_cast %29 : vector<1x96xf32> to vector<96xf32>
    %31 = vector.shape_cast %30 : vector<96xf32> to vector<1x96xf32>
    %32 = vector.broadcast %31 : vector<1x96xf32> to vector<16x96xf32>
    %33 = arith.addf %28, %32 : vector<16x96xf32>
    %34 = vector.extract_strided_slice %33 {offsets = [0, 0], sizes = [16, 8], strides = [1, 1]} : vector<16x96xf32> to vector<16x8xf32>
    %35 = vector.shape_cast %34 : vector<16x8xf32> to vector<2x8x8xf32>
    %36 = vector.extract_strided_slice %33 {offsets = [0, 32], sizes = [16, 8], strides = [1, 1]} : vector<16x96xf32> to vector<16x8xf32>
    %37 = vector.shape_cast %36 : vector<16x8xf32> to vector<2x8x8xf32>
    %38 = vector.extract_strided_slice %33 {offsets = [0, 64], sizes = [16, 8], strides = [1, 1]} : vector<16x96xf32> to vector<16x8xf32>
    %39 = vector.shape_cast %38 : vector<16x8xf32> to vector<2x8x8xf32>
    "tpu.trace_start"() <{level = 10 : i32, message = "bqd,bkd->bqk"}> : () -> ()
    %cst_14 = arith.constant dense<0.000000e+00> : vector<2x8x8xf32>
    %40 = tpu.matmul %35, %37, %cst_14 {dimension_numbers = #tpu.dot_dimension_numbers<[2], [2], [1], [1], [0, 0, 0, 1, 1, 1], [0], [0]>} : vector<2x8x8xf32>, vector<2x8x8xf32>, vector<2x8x8xf32> -> vector<2x8x8xf32>
    "tpu.trace_stop"() : () -> ()
    %cst_15 = arith.constant dense<0xFF800000> : vector<2x8xf32>
    %41 = vector.multi_reduction <maximumf>, %40, %cst_15 [2] : vector<2x8x8xf32> to vector<2x8xf32>
    %42 = vector.shape_cast %41 : vector<2x8xf32> to vector<2x8x1xf32>
    %43 = vector.broadcast %42 : vector<2x8x1xf32> to vector<2x8x8xf32>
    %44 = arith.subf %40, %43 : vector<2x8x8xf32>
    %45 = math.exp %44 : vector<2x8x8xf32>
    %cst_16 = arith.constant dense<0.000000e+00> : vector<2x8xf32>
    %46 = vector.multi_reduction <add>, %45, %cst_16 [2] : vector<2x8x8xf32> to vector<2x8xf32>
    %47 = vector.shape_cast %46 : vector<2x8xf32> to vector<2x8x1xf32>
    %48 = tpu.reciprocal %47 : vector<2x8x1xf32> -> vector<2x8x1xf32>
    %49 = vector.broadcast %48 : vector<2x8x1xf32> to vector<2x8x8xf32>
    %50 = arith.mulf %45, %49 : vector<2x8x8xf32>
    "tpu.trace_start"() <{level = 10 : i32, message = "bqk,bkd->bqd"}> : () -> ()
    %cst_17 = arith.constant dense<0.000000e+00> : vector<2x8x8xf32>
    %51 = tpu.matmul %50, %39, %cst_17 {dimension_numbers = #tpu.dot_dimension_numbers<[2], [1], [1], [2], [0, 0, 0, 1, 1, 2], [0], [0]>} : vector<2x8x8xf32>, vector<2x8x8xf32>, vector<2x8x8xf32> -> vector<2x8x8xf32>
    "tpu.trace_stop"() : () -> ()
    %52 = vector.shape_cast %51 : vector<2x8x8xf32> to vector<16x8xf32>
    %c0_18 = arith.constant 0 : index
    %c0_19 = arith.constant 0 : index
    %53 = vector.load %arg15[%c0_18, %c0_19] : memref<16x32xf32, #tpu.memory_space<vmem>>, vector<16x8xf32>
    tpu.vector_store %arg15[%c0_18, %c0_19], %52 {strides = array<i32>} : memref<16x32xf32, #tpu.memory_space<vmem>>, vector<16x8xf32>,
    %54 = vector.extract_strided_slice %33 {offsets = [0, 8], sizes = [16, 8], strides = [1, 1]} : vector<16x96xf32> to vector<16x8xf32>
    %55 = vector.shape_cast %54 : vector<16x8xf32> to vector<2x8x8xf32>
    %56 = vector.extract_strided_slice %33 {offsets = [0, 40], sizes = [16, 8], strides = [1, 1]} : vector<16x96xf32> to vector<16x8xf32>
    %57 = vector.shape_cast %56 : vector<16x8xf32> to vector<2x8x8xf32>
    %58 = vector.extract_strided_slice %33 {offsets = [0, 72], sizes = [16, 8], strides = [1, 1]} : vector<16x96xf32> to vector<16x8xf32>
    %59 = vector.shape_cast %58 : vector<16x8xf32> to vector<2x8x8xf32>
    "tpu.trace_start"() <{level = 10 : i32, message = "bqd,bkd->bqk"}> : () -> ()
    %cst_20 = arith.constant dense<0.000000e+00> : vector<2x8x8xf32>
    %60 = tpu.matmul %55, %57, %cst_20 {dimension_numbers = #tpu.dot_dimension_numbers<[2], [2], [1], [1], [0, 0, 0, 1, 1, 1], [0], [0]>} : vector<2x8x8xf32>, vector<2x8x8xf32>, vector<2x8x8xf32> -> vector<2x8x8xf32>
    "tpu.trace_stop"() : () -> ()
    %cst_21 = arith.constant dense<0xFF800000> : vector<2x8xf32>
    %61 = vector.multi_reduction <maximumf>, %60, %cst_21 [2] : vector<2x8x8xf32> to vector<2x8xf32>
    %62 = vector.shape_cast %61 : vector<2x8xf32> to vector<2x8x1xf32>
    %63 = vector.broadcast %62 : vector<2x8x1xf32> to vector<2x8x8xf32>
    %64 = arith.subf %60, %63 : vector<2x8x8xf32>
    %65 = math.exp %64 : vector<2x8x8xf32>
    %cst_22 = arith.constant dense<0.000000e+00> : vector<2x8xf32>
    %66 = vector.multi_reduction <add>, %65, %cst_22 [2] : vector<2x8x8xf32> to vector<2x8xf32>
    %67 = vector.shape_cast %66 : vector<2x8xf32> to vector<2x8x1xf32>
    %68 = tpu.reciprocal %67 : vector<2x8x1xf32> -> vector<2x8x1xf32>
    %69 = vector.broadcast %68 : vector<2x8x1xf32> to vector<2x8x8xf32>
    %70 = arith.mulf %65, %69 : vector<2x8x8xf32>
    "tpu.trace_start"() <{level = 10 : i32, message = "bqk,bkd->bqd"}> : () -> ()
    %cst_23 = arith.constant dense<0.000000e+00> : vector<2x8x8xf32>
    %71 = tpu.matmul %70, %59, %cst_23 {dimension_numbers = #tpu.dot_dimension_numbers<[2], [1], [1], [2], [0, 0, 0, 1, 1, 2], [0], [0]>} : vector<2x8x8xf32>, vector<2x8x8xf32>, vector<2x8x8xf32> -> vector<2x8x8xf32>
    "tpu.trace_stop"() : () -> ()
    %72 = vector.shape_cast %71 : vector<2x8x8xf32> to vector<16x8xf32>
    %c0_24 = arith.constant 0 : index
    %c8 = arith.constant 8 : index
    %73 = vector.load %arg15[%c0_24, %c8] : memref<16x32xf32, #tpu.memory_space<vmem>>, vector<16x8xf32>
    tpu.vector_store %arg15[%c0_24, %c8], %72 {strides = array<i32>} : memref<16x32xf32, #tpu.memory_space<vmem>>, vector<16x8xf32>,
    %74 = vector.extract_strided_slice %33 {offsets = [0, 16], sizes = [16, 8], strides = [1, 1]} : vector<16x96xf32> to vector<16x8xf32>
    %75 = vector.shape_cast %74 : vector<16x8xf32> to vector<2x8x8xf32>
    %76 = vector.extract_strided_slice %33 {offsets = [0, 48], sizes = [16, 8], strides = [1, 1]} : vector<16x96xf32> to vector<16x8xf32>
    %77 = vector.shape_cast %76 : vector<16x8xf32> to vector<2x8x8xf32>
    %78 = vector.extract_strided_slice %33 {offsets = [0, 80], sizes = [16, 8], strides = [1, 1]} : vector<16x96xf32> to vector<16x8xf32>
    %79 = vector.shape_cast %78 : vector<16x8xf32> to vector<2x8x8xf32>
    "tpu.trace_start"() <{level = 10 : i32, message = "bqd,bkd->bqk"}> : () -> ()
    %cst_25 = arith.constant dense<0.000000e+00> : vector<2x8x8xf32>
    %80 = tpu.matmul %75, %77, %cst_25 {dimension_numbers = #tpu.dot_dimension_numbers<[2], [2], [1], [1], [0, 0, 0, 1, 1, 1], [0], [0]>} : vector<2x8x8xf32>, vector<2x8x8xf32>, vector<2x8x8xf32> -> vector<2x8x8xf32>
    "tpu.trace_stop"() : () -> ()
    %cst_26 = arith.constant dense<0xFF800000> : vector<2x8xf32>
    %81 = vector.multi_reduction <maximumf>, %80, %cst_26 [2] : vector<2x8x8xf32> to vector<2x8xf32>
    %82 = vector.shape_cast %81 : vector<2x8xf32> to vector<2x8x1xf32>
    %83 = vector.broadcast %82 : vector<2x8x1xf32> to vector<2x8x8xf32>
    %84 = arith.subf %80, %83 : vector<2x8x8xf32>
    %85 = math.exp %84 : vector<2x8x8xf32>
    %cst_27 = arith.constant dense<0.000000e+00> : vector<2x8xf32>
    %86 = vector.multi_reduction <add>, %85, %cst_27 [2] : vector<2x8x8xf32> to vector<2x8xf32>
    %87 = vector.shape_cast %86 : vector<2x8xf32> to vector<2x8x1xf32>
    %88 = tpu.reciprocal %87 : vector<2x8x1xf32> -> vector<2x8x1xf32>
    %89 = vector.broadcast %88 : vector<2x8x1xf32> to vector<2x8x8xf32>
    %90 = arith.mulf %85, %89 : vector<2x8x8xf32>
    "tpu.trace_start"() <{level = 10 : i32, message = "bqk,bkd->bqd"}> : () -> ()
    %cst_28 = arith.constant dense<0.000000e+00> : vector<2x8x8xf32>
    %91 = tpu.matmul %90, %79, %cst_28 {dimension_numbers = #tpu.dot_dimension_numbers<[2], [1], [1], [2], [0, 0, 0, 1, 1, 2], [0], [0]>} : vector<2x8x8xf32>, vector<2x8x8xf32>, vector<2x8x8xf32> -> vector<2x8x8xf32>
    "tpu.trace_stop"() : () -> ()
    %92 = vector.shape_cast %91 : vector<2x8x8xf32> to vector<16x8xf32>
    %c0_29 = arith.constant 0 : index
    %c16 = arith.constant 16 : index
    %93 = vector.load %arg15[%c0_29, %c16] : memref<16x32xf32, #tpu.memory_space<vmem>>, vector<16x8xf32>
    tpu.vector_store %arg15[%c0_29, %c16], %92 {strides = array<i32>} : memref<16x32xf32, #tpu.memory_space<vmem>>, vector<16x8xf32>,
    %94 = vector.extract_strided_slice %33 {offsets = [0, 24], sizes = [16, 8], strides = [1, 1]} : vector<16x96xf32> to vector<16x8xf32>
    %95 = vector.shape_cast %94 : vector<16x8xf32> to vector<2x8x8xf32>
    %96 = vector.extract_strided_slice %33 {offsets = [0, 56], sizes = [16, 8], strides = [1, 1]} : vector<16x96xf32> to vector<16x8xf32>
    %97 = vector.shape_cast %96 : vector<16x8xf32> to vector<2x8x8xf32>
    %98 = vector.extract_strided_slice %33 {offsets = [0, 88], sizes = [16, 8], strides = [1, 1]} : vector<16x96xf32> to vector<16x8xf32>
    %99 = vector.shape_cast %98 : vector<16x8xf32> to vector<2x8x8xf32>
    "tpu.trace_start"() <{level = 10 : i32, message = "bqd,bkd->bqk"}> : () -> ()
    %cst_30 = arith.constant dense<0.000000e+00> : vector<2x8x8xf32>
    %100 = tpu.matmul %95, %97, %cst_30 {dimension_numbers = #tpu.dot_dimension_numbers<[2], [2], [1], [1], [0, 0, 0, 1, 1, 1], [0], [0]>} : vector<2x8x8xf32>, vector<2x8x8xf32>, vector<2x8x8xf32> -> vector<2x8x8xf32>
    "tpu.trace_stop"() : () -> ()
    %cst_31 = arith.constant dense<0xFF800000> : vector<2x8xf32>
    %101 = vector.multi_reduction <maximumf>, %100, %cst_31 [2] : vector<2x8x8xf32> to vector<2x8xf32>
    %102 = vector.shape_cast %101 : vector<2x8xf32> to vector<2x8x1xf32>
    %103 = vector.broadcast %102 : vector<2x8x1xf32> to vector<2x8x8xf32>
    %104 = arith.subf %100, %103 : vector<2x8x8xf32>
    %105 = math.exp %104 : vector<2x8x8xf32>
    %cst_32 = arith.constant dense<0.000000e+00> : vector<2x8xf32>
    %106 = vector.multi_reduction <add>, %105, %cst_32 [2] : vector<2x8x8xf32> to vector<2x8xf32>
    %107 = vector.shape_cast %106 : vector<2x8xf32> to vector<2x8x1xf32>
    %108 = tpu.reciprocal %107 : vector<2x8x1xf32> -> vector<2x8x1xf32>
    %109 = vector.broadcast %108 : vector<2x8x1xf32> to vector<2x8x8xf32>
    %110 = arith.mulf %105, %109 : vector<2x8x8xf32>
    "tpu.trace_start"() <{level = 10 : i32, message = "bqk,bkd->bqd"}> : () -> ()
    %cst_33 = arith.constant dense<0.000000e+00> : vector<2x8x8xf32>
    %111 = tpu.matmul %110, %99, %cst_33 {dimension_numbers = #tpu.dot_dimension_numbers<[2], [1], [1], [2], [0, 0, 0, 1, 1, 2], [0], [0]>} : vector<2x8x8xf32>, vector<2x8x8xf32>, vector<2x8x8xf32> -> vector<2x8x8xf32>
    "tpu.trace_stop"() : () -> ()
    %112 = vector.shape_cast %111 : vector<2x8x8xf32> to vector<16x8xf32>
    %c0_34 = arith.constant 0 : index
    %c24 = arith.constant 24 : index
    %113 = vector.load %arg15[%c0_34, %c24] : memref<16x32xf32, #tpu.memory_space<vmem>>, vector<16x8xf32>
    tpu.vector_store %arg15[%c0_34, %c24], %112 {strides = array<i32>} : memref<16x32xf32, #tpu.memory_space<vmem>>, vector<16x8xf32>,
    %c0_35 = arith.constant 0 : index
    %c0_36 = arith.constant 0 : index
    %114 = vector.load %arg15[%c0_35, %c0_36] : memref<16x32xf32, #tpu.memory_space<vmem>>, vector<16x32xf32>
    %c0_37 = arith.constant 0 : index
    %c0_38 = arith.constant 0 : index
    %115 = vector.load %arg6[%c0_37, %c0_38] : memref<32x32xf32, #tpu.memory_space<vmem>>, vector<32x32xf32>
    %cst_39 = arith.constant dense<0.000000e+00> : vector<16x32xf32>
    %116 = tpu.matmul %114, %115, %cst_39 {dimension_numbers = #tpu.dot_dimension_numbers<[1], [0], [0], [1], [0, 0, 1, 1], [], []>} : vector<16x32xf32>, vector<32x32xf32>, vector<16x32xf32> -> vector<16x32xf32>
    %c0_40 = arith.constant 0 : index
    %c0_41 = arith.constant 0 : index
    %117 = vector.load %arg7[%c0_40, %c0_41] : memref<1x32xf32, #tpu.memory_space<vmem>>, vector<1x32xf32>
    %118 = vector.shape_cast %117 : vector<1x32xf32> to vector<32xf32>
    %119 = vector.shape_cast %118 : vector<32xf32> to vector<1x32xf32>
    %120 = vector.broadcast %119 : vector<1x32xf32> to vector<16x32xf32>
    %121 = arith.addf %116, %120 : vector<16x32xf32>
    %cst_42 = arith.constant dense<0.000000e+00> : vector<16xf32>
    %122 = vector.multi_reduction <add>, %121, %cst_42 [1] : vector<16x32xf32> to vector<16xf32>
    %123 = vector.shape_cast %122 : vector<16xf32> to vector<16x1xf32>
    %cst_43 = arith.constant 3.200000e+01 : f32
    %124 = vector.broadcast %cst_43 : f32 to vector<16x1xf32>
    %125 = arith.divf %123, %124 : vector<16x1xf32>
    %126 = vector.broadcast %125 : vector<16x1xf32> to vector<16x32xf32>
    %127 = arith.subf %121, %126 : vector<16x32xf32>
    %128 = arith.mulf %127, %127 : vector<16x32xf32>
    %cst_44 = arith.constant dense<0.000000e+00> : vector<16xf32>
    %129 = vector.multi_reduction <add>, %128, %cst_44 [1] : vector<16x32xf32> to vector<16xf32>
    %130 = vector.shape_cast %129 : vector<16xf32> to vector<16x1xf32>
    %cst_45 = arith.constant 3.200000e+01 : f32
    %131 = vector.broadcast %cst_45 : f32 to vector<16x1xf32>
    %132 = arith.divf %130, %131 : vector<16x1xf32>
    %cst_46 = arith.constant 9.99999974E-6 : f32
    %133 = vector.broadcast %cst_46 : f32 to vector<16x1xf32>
    %134 = arith.addf %132, %133 : vector<16x1xf32>
    %135 = math.rsqrt %134 : vector<16x1xf32>
    %136 = vector.broadcast %135 : vector<16x1xf32> to vector<16x32xf32>
    %137 = arith.mulf %127, %136 : vector<16x32xf32>
    %c0_47 = arith.constant 0 : index
    %c0_48 = arith.constant 0 : index
    %138 = vector.load %arg8[%c0_47, %c0_48] : memref<1x32xf32, #tpu.memory_space<vmem>>, vector<1x32xf32>
    %139 = vector.shape_cast %138 : vector<1x32xf32> to vector<32xf32>
    %140 = vector.shape_cast %139 : vector<32xf32> to vector<1x32xf32>
    %141 = vector.broadcast %140 : vector<1x32xf32> to vector<16x32xf32>
    %142 = arith.mulf %137, %141 : vector<16x32xf32>
    %c0_49 = arith.constant 0 : index
    %c0_50 = arith.constant 0 : index
    %143 = vector.load %arg9[%c0_49, %c0_50] : memref<1x32xf32, #tpu.memory_space<vmem>>, vector<1x32xf32>
    %144 = vector.shape_cast %143 : vector<1x32xf32> to vector<32xf32>
    %145 = vector.shape_cast %144 : vector<32xf32> to vector<1x32xf32>
    %146 = vector.broadcast %145 : vector<1x32xf32> to vector<16x32xf32>
    %147 = arith.addf %142, %146 : vector<16x32xf32>
    %c0_51 = arith.constant 0 : index
    %c0_52 = arith.constant 0 : index
    %148 = vector.load %arg10[%c0_51, %c0_52] : memref<32x64xf32, #tpu.memory_space<vmem>>, vector<32x64xf32>
    %cst_53 = arith.constant dense<0.000000e+00> : vector<16x64xf32>
    %149 = tpu.matmul %147, %148, %cst_53 {dimension_numbers = #tpu.dot_dimension_numbers<[1], [0], [0], [1], [0, 0, 1, 1], [], []>} : vector<16x32xf32>, vector<32x64xf32>, vector<16x64xf32> -> vector<16x64xf32>
    %c0_54 = arith.constant 0 : index
    %c0_55 = arith.constant 0 : index
    %150 = vector.load %arg11[%c0_54, %c0_55] : memref<1x64xf32, #tpu.memory_space<vmem>>, vector<1x64xf32>
    %151 = vector.shape_cast %150 : vector<1x64xf32> to vector<64xf32>
    %152 = vector.shape_cast %151 : vector<64xf32> to vector<1x64xf32>
    %153 = vector.broadcast %152 : vector<1x64xf32> to vector<16x64xf32>
    %154 = arith.addf %149, %153 : vector<16x64xf32>
    %cst_56 = arith.constant 5.000000e-01 : f32
    %155 = vector.broadcast %cst_56 : f32 to vector<16x64xf32>
    %156 = arith.mulf %155, %154 : vector<16x64xf32>
    %cst_57 = arith.constant 0.707106769 : f32
    %157 = vector.broadcast %cst_57 : f32 to vector<16x64xf32>
    %158 = arith.mulf %154, %157 : vector<16x64xf32>
    %159 = math.erf %158 : vector<16x64xf32>
    %cst_58 = arith.constant 1.000000e+00 : f32
    %160 = vector.broadcast %cst_58 : f32 to vector<16x64xf32>
    %161 = arith.addf %160, %159 : vector<16x64xf32>
    %162 = arith.mulf %156, %161 : vector<16x64xf32>
    %c0_59 = arith.constant 0 : index
    %c0_60 = arith.constant 0 : index
    %163 = vector.load %arg12[%c0_59, %c0_60] : memref<64x32xf32, #tpu.memory_space<vmem>>, vector<64x32xf32>
    %cst_61 = arith.constant dense<0.000000e+00> : vector<16x32xf32>
    %164 = tpu.matmul %162, %163, %cst_61 {dimension_numbers = #tpu.dot_dimension_numbers<[1], [0], [0], [1], [0, 0, 1, 1], [], []>} : vector<16x64xf32>, vector<64x32xf32>, vector<16x32xf32> -> vector<16x32xf32>
    %c0_62 = arith.constant 0 : index
    %c0_63 = arith.constant 0 : index
    %165 = vector.load %arg13[%c0_62, %c0_63] : memref<1x32xf32, #tpu.memory_space<vmem>>, vector<1x32xf32>
    %166 = vector.shape_cast %165 : vector<1x32xf32> to vector<32xf32>
    %167 = vector.shape_cast %166 : vector<32xf32> to vector<1x32xf32>
    %168 = vector.broadcast %167 : vector<1x32xf32> to vector<16x32xf32>
    %169 = arith.addf %164, %168 : vector<16x32xf32>
    %c0_64 = arith.constant 0 : index
    %c0_65 = arith.constant 0 : index
    %170 = vector.load %arg14[%c0_64, %c0_65] : memref<16x32xf32, #tpu.memory_space<vmem>>, vector<16x32xf32>
    tpu.vector_store %arg14[%c0_64, %c0_65], %169 {strides = array<i32>} : memref<16x32xf32, #tpu.memory_space<vmem>>, vector<16x32xf32>,
    return
  }
  func.func @transform_0(%arg0: i32) -> (i32, i32) {
    %c0_i32 = arith.constant 0 : i32
    %c0_i32_0 = arith.constant 0 : i32
    return %arg0, %c0_i32 : i32, i32
  }
  func.func @transform_1(%arg0: i32) -> (i32, i32) {
    %c0_i32 = arith.constant 0 : i32
    %c0_i32_0 = arith.constant 0 : i32
    %c0_i32_1 = arith.constant 0 : i32
    return %c0_i32, %c0_i32_0 : i32, i32
  }
  func.func @transform_2(%arg0: i32) -> (i32, i32) {
    %c0_i32 = arith.constant 0 : i32
    %c0_i32_0 = arith.constant 0 : i32
    %c0_i32_1 = arith.constant 0 : i32
    return %c0_i32, %c0_i32_0 : i32, i32
  }
  func.func @transform_3(%arg0: i32) -> (i32, i32) {
    %c0_i32 = arith.constant 0 : i32
    %c0_i32_0 = arith.constant 0 : i32
    %c0_i32_1 = arith.constant 0 : i32
    return %c0_i32, %c0_i32_0 : i32, i32
  }
  func.func @transform_4(%arg0: i32) -> (i32, i32) {
    %c0_i32 = arith.constant 0 : i32
    %c0_i32_0 = arith.constant 0 : i32
    %c0_i32_1 = arith.constant 0 : i32
    return %c0_i32, %c0_i32_0 : i32, i32
  }
  func.func @transform_5(%arg0: i32) -> (i32, i32) {
    %c0_i32 = arith.constant 0 : i32
    %c0_i32_0 = arith.constant 0 : i32
    %c0_i32_1 = arith.constant 0 : i32
    return %c0_i32, %c0_i32_0 : i32, i32
  }
  func.func @transform_6(%arg0: i32) -> (i32, i32) {
    %c0_i32 = arith.constant 0 : i32
    %c0_i32_0 = arith.constant 0 : i32
    %c0_i32_1 = arith.constant 0 : i32
    return %c0_i32, %c0_i32_0 : i32, i32
  }
  func.func @transform_7(%arg0: i32) -> (i32, i32) {
    %c0_i32 = arith.constant 0 : i32
    %c0_i32_0 = arith.constant 0 : i32
    %c0_i32_1 = arith.constant 0 : i32
    return %c0_i32, %c0_i32_0 : i32, i32
  }
  func.func @transform_8(%arg0: i32) -> (i32, i32) {
    %c0_i32 = arith.constant 0 : i32
    %c0_i32_0 = arith.constant 0 : i32
    %c0_i32_1 = arith.constant 0 : i32
    return %c0_i32, %c0_i32_0 : i32, i32
  }
  func.func @transform_9(%arg0: i32) -> (i32, i32) {
    %c0_i32 = arith.constant 0 : i32
    %c0_i32_0 = arith.constant 0 : i32
    %c0_i32_1 = arith.constant 0 : i32
    return %c0_i32, %c0_i32_0 : i32, i32
  }
  func.func @transform_10(%arg0: i32) -> (i32, i32) {
    %c0_i32 = arith.constant 0 : i32
    %c0_i32_0 = arith.constant 0 : i32
    %c0_i32_1 = arith.constant 0 : i32
    return %c0_i32, %c0_i32_0 : i32, i32
  }
  func.func @transform_11(%arg0: i32) -> (i32, i32) {
    %c0_i32 = arith.constant 0 : i32
    %c0_i32_0 = arith.constant 0 : i32
    %c0_i32_1 = arith.constant 0 : i32
    return %c0_i32, %c0_i32_0 : i32, i32
  }
  func.func @transform_12(%arg0: i32) -> (i32, i32) {
    %c0_i32 = arith.constant 0 : i32
    %c0_i32_0 = arith.constant 0 : i32
    %c0_i32_1 = arith.constant 0 : i32
    return %c0_i32, %c0_i32_0 : i32, i32
  }
  func.func @transform_13(%arg0: i32) -> (i32, i32) {
    %c0_i32 = arith.constant 0 : i32
    %c0_i32_0 = arith.constant 0 : i32
    return %arg0, %c0_i32 : i32, i32
  }
}

module attributes {stable_mosaic.version = 11 : i64} {
  func.func @_encoder_layer_kernel(%arg0: i32, %arg1: memref<16x32xf32, #tpu.memory_space<vmem>>, %arg2: memref<1x32xf32, #tpu.memory_space<vmem>>, %arg3: memref<1x32xf32, #tpu.memory_space<vmem>>, %arg4: memref<32x96xf32, #tpu.memory_space<vmem>>, %arg5: memref<1x96xf32, #tpu.memory_space<vmem>>, %arg6: memref<32x32xf32, #tpu.memory_space<vmem>>, %arg7: memref<1x32xf32, #tpu.memory_space<vmem>>, %arg8: memref<1x32xf32, #tpu.memory_space<vmem>>, %arg9: memref<1x32xf32, #tpu.memory_space<vmem>>, %arg10: memref<32x64xf32, #tpu.memory_space<vmem>>, %arg11: memref<1x64xf32, #tpu.memory_space<vmem>>, %arg12: memref<64x32xf32, #tpu.memory_space<vmem>>, %arg13: memref<1x32xf32, #tpu.memory_space<vmem>>, %arg14: memref<16x32xf32, #tpu.memory_space<vmem>>, %arg15: memref<16x32xf32, #tpu.memory_space<vmem>>) attributes {dimension_semantics = [#tpu.dimension_semantics<parallel>], iteration_bounds = array<i64: 1>, scalar_prefetch = 0 : i64, scratch_operands = 1 : i64, tpu.core_type = #tpu.core_type<tc>, window_params = [{transform_indices = @transform_0, window_bounds = array<i64: 16, 32>}, {pipeline_mode = #tpu.pipeline_mode<synchronous>, transform_indices = @transform_1, window_bounds = array<i64: 1, 32>}, {pipeline_mode = #tpu.pipeline_mode<synchronous>, transform_indices = @transform_2, window_bounds = array<i64: 1, 32>}, {pipeline_mode = #tpu.pipeline_mode<synchronous>, transform_indices = @transform_3, window_bounds = array<i64: 32, 96>}, {pipeline_mode = #tpu.pipeline_mode<synchronous>, transform_indices = @transform_4, window_bounds = array<i64: 1, 96>}, {pipeline_mode = #tpu.pipeline_mode<synchronous>, transform_indices = @transform_5, window_bounds = array<i64: 32, 32>}, {pipeline_mode = #tpu.pipeline_mode<synchronous>, transform_indices = @transform_6, window_bounds = array<i64: 1, 32>}, {pipeline_mode = #tpu.pipeline_mode<synchronous>, transform_indices = @transform_7, window_bounds = array<i64: 1, 32>}, {pipeline_mode = #tpu.pipeline_mode<synchronous>, transform_indices = @transform_8, window_bounds = array<i64: 1, 32>}, {pipeline_mode = #tpu.pipeline_mode<synchronous>, transform_indices = @transform_9, window_bounds = array<i64: 32, 64>}, {pipeline_mode = #tpu.pipeline_mode<synchronous>, transform_indices = @transform_10, window_bounds = array<i64: 1, 64>}, {pipeline_mode = #tpu.pipeline_mode<synchronous>, transform_indices = @transform_11, window_bounds = array<i64: 64, 32>}, {pipeline_mode = #tpu.pipeline_mode<synchronous>, transform_indices = @transform_12, window_bounds = array<i64: 1, 32>}, {transform_indices = @transform_13, window_bounds = array<i64: 16, 32>}]} {
    %c0 = arith.constant 0 : index
    %c0_0 = arith.constant 0 : index
    %0 = vector.load %arg1[%c0, %c0_0] : memref<16x32xf32, #tpu.memory_space<vmem>>, vector<16x32xf32>
    %cst = arith.constant dense<0.000000e+00> : vector<16xf32>
    %1 = vector.multi_reduction <add>, %0, %cst [1] : vector<16x32xf32> to vector<16xf32>
    %2 = vector.shape_cast %1 : vector<16xf32> to vector<16x1xf32>
    %cst_1 = arith.constant 3.200000e+01 : f32
    %3 = vector.broadcast %cst_1 : f32 to vector<16x1xf32>
    %4 = arith.divf %2, %3 : vector<16x1xf32>
    %5 = vector.broadcast %4 : vector<16x1xf32> to vector<16x32xf32>
    %6 = arith.subf %0, %5 : vector<16x32xf32>
    %7 = arith.mulf %6, %6 : vector<16x32xf32>
    %cst_2 = arith.constant dense<0.000000e+00> : vector<16xf32>
    %8 = vector.multi_reduction <add>, %7, %cst_2 [1] : vector<16x32xf32> to vector<16xf32>
    %9 = vector.shape_cast %8 : vector<16xf32> to vector<16x1xf32>
    %cst_3 = arith.constant 3.200000e+01 : f32
    %10 = vector.broadcast %cst_3 : f32 to vector<16x1xf32>
    %11 = arith.divf %9, %10 : vector<16x1xf32>
    %cst_4 = arith.constant 9.99999974E-6 : f32
    %12 = vector.broadcast %cst_4 : f32 to vector<16x1xf32>
    %13 = arith.addf %11, %12 : vector<16x1xf32>
    %14 = math.rsqrt %13 : vector<16x1xf32>
    %15 = vector.broadcast %14 : vector<16x1xf32> to vector<16x32xf32>
    %16 = arith.mulf %6, %15 : vector<16x32xf32>
    %c0_5 = arith.constant 0 : index
    %c0_6 = arith.constant 0 : index
    %17 = vector.load %arg2[%c0_5, %c0_6] : memref<1x32xf32, #tpu.memory_space<vmem>>, vector<1x32xf32>
    %18 = vector.shape_cast %17 : vector<1x32xf32> to vector<32xf32>
    %19 = vector.shape_cast %18 : vector<32xf32> to vector<1x32xf32>
    %20 = vector.broadcast %19 : vector<1x32xf32> to vector<16x32xf32>
    %21 = arith.mulf %16, %20 : vector<16x32xf32>
    %c0_7 = arith.constant 0 : index
    %c0_8 = arith.constant 0 : index
    %22 = vector.load %arg3[%c0_7, %c0_8] : memref<1x32xf32, #tpu.memory_space<vmem>>, vector<1x32xf32>
    %23 = vector.shape_cast %22 : vector<1x32xf32> to vector<32xf32>
    %24 = vector.shape_cast %23 : vector<32xf32> to vector<1x32xf32>
    %25 = vector.broadcast %24 : vector<1x32xf32> to vector<16x32xf32>
    %26 = arith.addf %21, %25 : vector<16x32xf32>
    %c0_9 = arith.constant 0 : index
    %c0_10 = arith.constant 0 : index
    %27 = vector.load %arg4[%c0_9, %c0_10] : memref<32x96xf32, #tpu.memory_space<vmem>>, vector<32x96xf32>
    %cst_11 = arith.constant dense<0.000000e+00> : vector<16x96xf32>
    %28 = tpu.matmul %26, %27, %cst_11 {dimension_numbers = #tpu.dot_dimension_numbers<[1], [0], [0], [1], [0, 0, 1, 1], [], []>} : vector<16x32xf32>, vector<32x96xf32>, vector<16x96xf32> -> vector<16x96xf32>
    %c0_12 = arith.constant 0 : index
    %c0_13 = arith.constant 0 : index
    %29 = vector.load %arg5[%c0_12, %c0_13] : memref<1x96xf32, #tpu.memory_space<vmem>>, vector<1x96xf32>
    %30 = vector.shape_cast %29 : vector<1x96xf32> to vector<96xf32>
    %31 = vector.shape_cast %30 : vector<96xf32> to vector<1x96xf32>
    %32 = vector.broadcast %31 : vector<1x96xf32> to vector<16x96xf32>
    %33 = arith.addf %28, %32 : vector<16x96xf32>
    %34 = vector.extract_strided_slice %33 {offsets = [0, 0], sizes = [16, 8], strides = [1, 1]} : vector<16x96xf32> to vector<16x8xf32>
    %35 = vector.shape_cast %34 : vector<16x8xf32> to vector<2x8x8xf32>
    %36 = vector.extract_strided_slice %33 {offsets = [0, 32], sizes = [16, 8], strides = [1, 1]} : vector<16x96xf32> to vector<16x8xf32>
    %37 = vector.shape_cast %36 : vector<16x8xf32> to vector<2x8x8xf32>
    %38 = vector.extract_strided_slice %33 {offsets = [0, 64], sizes = [16, 8], strides = [1, 1]} : vector<16x96xf32> to vector<16x8xf32>
    %39 = vector.shape_cast %38 : vector<16x8xf32> to vector<2x8x8xf32>
    "tpu.trace_start"() <{level = 10 : i32, message = "bqd,bkd->bqk"}> : () -> ()
    %cst_14 = arith.constant dense<0.000000e+00> : vector<2x8x8xf32>
    %40 = tpu.matmul %35, %37, %cst_14 {dimension_numbers = #tpu.dot_dimension_numbers<[2], [2], [1], [1], [0, 0, 0, 1, 1, 1], [0], [0]>} : vector<2x8x8xf32>, vector<2x8x8xf32>, vector<2x8x8xf32> -> vector<2x8x8xf32>
    "tpu.trace_stop"() : () -> ()
    %cst_15 = arith.constant dense<0xFF800000> : vector<2x8xf32>
    %41 = vector.multi_reduction <maximumf>, %40, %cst_15 [2] : vector<2x8x8xf32> to vector<2x8xf32>
    %42 = vector.shape_cast %41 : vector<2x8xf32> to vector<2x8x1xf32>
    %43 = vector.broadcast %42 : vector<2x8x1xf32> to vector<2x8x8xf32>
    %44 = arith.subf %40, %43 : vector<2x8x8xf32>
    %45 = math.exp %44 : vector<2x8x8xf32>
    %cst_16 = arith.constant dense<0.000000e+00> : vector<2x8xf32>
    %46 = vector.multi_reduction <add>, %45, %cst_16 [2] : vector<2x8x8xf32> to vector<2x8xf32>
    %47 = vector.shape_cast %46 : vector<2x8xf32> to vector<2x8x1xf32>
    %48 = tpu.reciprocal %47 : vector<2x8x1xf32> -> vector<2x8x1xf32>
    %49 = vector.broadcast %48 : vector<2x8x1xf32> to vector<2x8x8xf32>
    %50 = arith.mulf %45, %49 : vector<2x8x8xf32>
    "tpu.trace_start"() <{level = 10 : i32, message = "bqk,bkd->bqd"}> : () -> ()
    %cst_17 = arith.constant dense<0.000000e+00> : vector<2x8x8xf32>
    %51 = tpu.matmul %50, %39, %cst_17 {dimension_numbers = #tpu.dot_dimension_numbers<[2], [1], [1], [2], [0, 0, 0, 1, 1, 2], [0], [0]>} : vector<2x8x8xf32>, vector<2x8x8xf32>, vector<2x8x8xf32> -> vector<2x8x8xf32>
    "tpu.trace_stop"() : () -> ()
    %52 = vector.shape_cast %51 : vector<2x8x8xf32> to vector<16x8xf32>
    %c0_18 = arith.constant 0 : index
    %c0_19 = arith.constant 0 : index
    %53 = vector.load %arg15[%c0_18, %c0_19] : memref<16x32xf32, #tpu.memory_space<vmem>>, vector<16x8xf32>
    tpu.vector_store %arg15[%c0_18, %c0_19], %52 {strides = array<i32>} : memref<16x32xf32, #tpu.memory_space<vmem>>, vector<16x8xf32>,
    %54 = vector.extract_strided_slice %33 {offsets = [0, 8], sizes = [16, 8], strides = [1, 1]} : vector<16x96xf32> to vector<16x8xf32>
    %55 = vector.shape_cast %54 : vector<16x8xf32> to vector<2x8x8xf32>
    %56 = vector.extract_strided_slice %33 {offsets = [0, 40], sizes = [16, 8], strides = [1, 1]} : vector<16x96xf32> to vector<16x8xf32>
    %57 = vector.shape_cast %56 : vector<16x8xf32> to vector<2x8x8xf32>
    %58 = vector.extract_strided_slice %33 {offsets = [0, 72], sizes = [16, 8], strides = [1, 1]} : vector<16x96xf32> to vector<16x8xf32>
    %59 = vector.shape_cast %58 : vector<16x8xf32> to vector<2x8x8xf32>
    "tpu.trace_start"() <{level = 10 : i32, message = "bqd,bkd->bqk"}> : () -> ()
    %cst_20 = arith.constant dense<0.000000e+00> : vector<2x8x8xf32>
    %60 = tpu.matmul %55, %57, %cst_20 {dimension_numbers = #tpu.dot_dimension_numbers<[2], [2], [1], [1], [0, 0, 0, 1, 1, 1], [0], [0]>} : vector<2x8x8xf32>, vector<2x8x8xf32>, vector<2x8x8xf32> -> vector<2x8x8xf32>
    "tpu.trace_stop"() : () -> ()
    %cst_21 = arith.constant dense<0xFF800000> : vector<2x8xf32>
    %61 = vector.multi_reduction <maximumf>, %60, %cst_21 [2] : vector<2x8x8xf32> to vector<2x8xf32>
    %62 = vector.shape_cast %61 : vector<2x8xf32> to vector<2x8x1xf32>
    %63 = vector.broadcast %62 : vector<2x8x1xf32> to vector<2x8x8xf32>
    %64 = arith.subf %60, %63 : vector<2x8x8xf32>
    %65 = math.exp %64 : vector<2x8x8xf32>
    %cst_22 = arith.constant dense<0.000000e+00> : vector<2x8xf32>
    %66 = vector.multi_reduction <add>, %65, %cst_22 [2] : vector<2x8x8xf32> to vector<2x8xf32>
    %67 = vector.shape_cast %66 : vector<2x8xf32> to vector<2x8x1xf32>
    %68 = tpu.reciprocal %67 : vector<2x8x1xf32> -> vector<2x8x1xf32>
    %69 = vector.broadcast %68 : vector<2x8x1xf32> to vector<2x8x8xf32>
    %70 = arith.mulf %65, %69 : vector<2x8x8xf32>
    "tpu.trace_start"() <{level = 10 : i32, message = "bqk,bkd->bqd"}> : () -> ()
    %cst_23 = arith.constant dense<0.000000e+00> : vector<2x8x8xf32>
    %71 = tpu.matmul %70, %59, %cst_23 {dimension_numbers = #tpu.dot_dimension_numbers<[2], [1], [1], [2], [0, 0, 0, 1, 1, 2], [0], [0]>} : vector<2x8x8xf32>, vector<2x8x8xf32>, vector<2x8x8xf32> -> vector<2x8x8xf32>
    "tpu.trace_stop"() : () -> ()
    %72 = vector.shape_cast %71 : vector<2x8x8xf32> to vector<16x8xf32>
    %c0_24 = arith.constant 0 : index
    %c8 = arith.constant 8 : index
    %73 = vector.load %arg15[%c0_24, %c8] : memref<16x32xf32, #tpu.memory_space<vmem>>, vector<16x8xf32>
    tpu.vector_store %arg15[%c0_24, %c8], %72 {strides = array<i32>} : memref<16x32xf32, #tpu.memory_space<vmem>>, vector<16x8xf32>,
    %74 = vector.extract_strided_slice %33 {offsets = [0, 16], sizes = [16, 8], strides = [1, 1]} : vector<16x96xf32> to vector<16x8xf32>
    %75 = vector.shape_cast %74 : vector<16x8xf32> to vector<2x8x8xf32>
    %76 = vector.extract_strided_slice %33 {offsets = [0, 48], sizes = [16, 8], strides = [1, 1]} : vector<16x96xf32> to vector<16x8xf32>
    %77 = vector.shape_cast %76 : vector<16x8xf32> to vector<2x8x8xf32>
    %78 = vector.extract_strided_slice %33 {offsets = [0, 80], sizes = [16, 8], strides = [1, 1]} : vector<16x96xf32> to vector<16x8xf32>
    %79 = vector.shape_cast %78 : vector<16x8xf32> to vector<2x8x8xf32>
    "tpu.trace_start"() <{level = 10 : i32, message = "bqd,bkd->bqk"}> : () -> ()
    %cst_25 = arith.constant dense<0.000000e+00> : vector<2x8x8xf32>
    %80 = tpu.matmul %75, %77, %cst_25 {dimension_numbers = #tpu.dot_dimension_numbers<[2], [2], [1], [1], [0, 0, 0, 1, 1, 1], [0], [0]>} : vector<2x8x8xf32>, vector<2x8x8xf32>, vector<2x8x8xf32> -> vector<2x8x8xf32>
    "tpu.trace_stop"() : () -> ()
    %cst_26 = arith.constant dense<0xFF800000> : vector<2x8xf32>
    %81 = vector.multi_reduction <maximumf>, %80, %cst_26 [2] : vector<2x8x8xf32> to vector<2x8xf32>
    %82 = vector.shape_cast %81 : vector<2x8xf32> to vector<2x8x1xf32>
    %83 = vector.broadcast %82 : vector<2x8x1xf32> to vector<2x8x8xf32>
    %84 = arith.subf %80, %83 : vector<2x8x8xf32>
    %85 = math.exp %84 : vector<2x8x8xf32>
    %cst_27 = arith.constant dense<0.000000e+00> : vector<2x8xf32>
    %86 = vector.multi_reduction <add>, %85, %cst_27 [2] : vector<2x8x8xf32> to vector<2x8xf32>
    %87 = vector.shape_cast %86 : vector<2x8xf32> to vector<2x8x1xf32>
    %88 = tpu.reciprocal %87 : vector<2x8x1xf32> -> vector<2x8x1xf32>
    %89 = vector.broadcast %88 : vector<2x8x1xf32> to vector<2x8x8xf32>
    %90 = arith.mulf %85, %89 : vector<2x8x8xf32>
    "tpu.trace_start"() <{level = 10 : i32, message = "bqk,bkd->bqd"}> : () -> ()
    %cst_28 = arith.constant dense<0.000000e+00> : vector<2x8x8xf32>
    %91 = tpu.matmul %90, %79, %cst_28 {dimension_numbers = #tpu.dot_dimension_numbers<[2], [1], [1], [2], [0, 0, 0, 1, 1, 2], [0], [0]>} : vector<2x8x8xf32>, vector<2x8x8xf32>, vector<2x8x8xf32> -> vector<2x8x8xf32>
    "tpu.trace_stop"() : () -> ()
    %92 = vector.shape_cast %91 : vector<2x8x8xf32> to vector<16x8xf32>
    %c0_29 = arith.constant 0 : index
    %c16 = arith.constant 16 : index
    %93 = vector.load %arg15[%c0_29, %c16] : memref<16x32xf32, #tpu.memory_space<vmem>>, vector<16x8xf32>
    tpu.vector_store %arg15[%c0_29, %c16], %92 {strides = array<i32>} : memref<16x32xf32, #tpu.memory_space<vmem>>, vector<16x8xf32>,
    %94 = vector.extract_strided_slice %33 {offsets = [0, 24], sizes = [16, 8], strides = [1, 1]} : vector<16x96xf32> to vector<16x8xf32>
    %95 = vector.shape_cast %94 : vector<16x8xf32> to vector<2x8x8xf32>
    %96 = vector.extract_strided_slice %33 {offsets = [0, 56], sizes = [16, 8], strides = [1, 1]} : vector<16x96xf32> to vector<16x8xf32>
    %97 = vector.shape_cast %96 : vector<16x8xf32> to vector<2x8x8xf32>
    %98 = vector.extract_strided_slice %33 {offsets = [0, 88], sizes = [16, 8], strides = [1, 1]} : vector<16x96xf32> to vector<16x8xf32>
    %99 = vector.shape_cast %98 : vector<16x8xf32> to vector<2x8x8xf32>
    "tpu.trace_start"() <{level = 10 : i32, message = "bqd,bkd->bqk"}> : () -> ()
    %cst_30 = arith.constant dense<0.000000e+00> : vector<2x8x8xf32>
    %100 = tpu.matmul %95, %97, %cst_30 {dimension_numbers = #tpu.dot_dimension_numbers<[2], [2], [1], [1], [0, 0, 0, 1, 1, 1], [0], [0]>} : vector<2x8x8xf32>, vector<2x8x8xf32>, vector<2x8x8xf32> -> vector<2x8x8xf32>
    "tpu.trace_stop"() : () -> ()
    %cst_31 = arith.constant dense<0xFF800000> : vector<2x8xf32>
    %101 = vector.multi_reduction <maximumf>, %100, %cst_31 [2] : vector<2x8x8xf32> to vector<2x8xf32>
    %102 = vector.shape_cast %101 : vector<2x8xf32> to vector<2x8x1xf32>
    %103 = vector.broadcast %102 : vector<2x8x1xf32> to vector<2x8x8xf32>
    %104 = arith.subf %100, %103 : vector<2x8x8xf32>
    %105 = math.exp %104 : vector<2x8x8xf32>
    %cst_32 = arith.constant dense<0.000000e+00> : vector<2x8xf32>
    %106 = vector.multi_reduction <add>, %105, %cst_32 [2] : vector<2x8x8xf32> to vector<2x8xf32>
    %107 = vector.shape_cast %106 : vector<2x8xf32> to vector<2x8x1xf32>
    %108 = tpu.reciprocal %107 : vector<2x8x1xf32> -> vector<2x8x1xf32>
    %109 = vector.broadcast %108 : vector<2x8x1xf32> to vector<2x8x8xf32>
    %110 = arith.mulf %105, %109 : vector<2x8x8xf32>
    "tpu.trace_start"() <{level = 10 : i32, message = "bqk,bkd->bqd"}> : () -> ()
    %cst_33 = arith.constant dense<0.000000e+00> : vector<2x8x8xf32>
    %111 = tpu.matmul %110, %99, %cst_33 {dimension_numbers = #tpu.dot_dimension_numbers<[2], [1], [1], [2], [0, 0, 0, 1, 1, 2], [0], [0]>} : vector<2x8x8xf32>, vector<2x8x8xf32>, vector<2x8x8xf32> -> vector<2x8x8xf32>
    "tpu.trace_stop"() : () -> ()
    %112 = vector.shape_cast %111 : vector<2x8x8xf32> to vector<16x8xf32>
    %c0_34 = arith.constant 0 : index
    %c24 = arith.constant 24 : index
    %113 = vector.load %arg15[%c0_34, %c24] : memref<16x32xf32, #tpu.memory_space<vmem>>, vector<16x8xf32>
    tpu.vector_store %arg15[%c0_34, %c24], %112 {strides = array<i32>} : memref<16x32xf32, #tpu.memory_space<vmem>>, vector<16x8xf32>,
    %c0_35 = arith.constant 0 : index
    %c0_36 = arith.constant 0 : index
    %114 = vector.load %arg15[%c0_35, %c0_36] : memref<16x32xf32, #tpu.memory_space<vmem>>, vector<16x32xf32>
    %c0_37 = arith.constant 0 : index
    %c0_38 = arith.constant 0 : index
    %115 = vector.load %arg6[%c0_37, %c0_38] : memref<32x32xf32, #tpu.memory_space<vmem>>, vector<32x32xf32>
    %cst_39 = arith.constant dense<0.000000e+00> : vector<16x32xf32>
    %116 = tpu.matmul %114, %115, %cst_39 {dimension_numbers = #tpu.dot_dimension_numbers<[1], [0], [0], [1], [0, 0, 1, 1], [], []>} : vector<16x32xf32>, vector<32x32xf32>, vector<16x32xf32> -> vector<16x32xf32>
    %c0_40 = arith.constant 0 : index
    %c0_41 = arith.constant 0 : index
    %117 = vector.load %arg7[%c0_40, %c0_41] : memref<1x32xf32, #tpu.memory_space<vmem>>, vector<1x32xf32>
    %118 = vector.shape_cast %117 : vector<1x32xf32> to vector<32xf32>
    %119 = vector.shape_cast %118 : vector<32xf32> to vector<1x32xf32>
    %120 = vector.broadcast %119 : vector<1x32xf32> to vector<16x32xf32>
    %121 = arith.addf %116, %120 : vector<16x32xf32>
    %cst_42 = arith.constant dense<0.000000e+00> : vector<16xf32>
    %122 = vector.multi_reduction <add>, %121, %cst_42 [1] : vector<16x32xf32> to vector<16xf32>
    %123 = vector.shape_cast %122 : vector<16xf32> to vector<16x1xf32>
    %cst_43 = arith.constant 3.200000e+01 : f32
    %124 = vector.broadcast %cst_43 : f32 to vector<16x1xf32>
    %125 = arith.divf %123, %124 : vector<16x1xf32>
    %126 = vector.broadcast %125 : vector<16x1xf32> to vector<16x32xf32>
    %127 = arith.subf %121, %126 : vector<16x32xf32>
    %128 = arith.mulf %127, %127 : vector<16x32xf32>
    %cst_44 = arith.constant dense<0.000000e+00> : vector<16xf32>
    %129 = vector.multi_reduction <add>, %128, %cst_44 [1] : vector<16x32xf32> to vector<16xf32>
    %130 = vector.shape_cast %129 : vector<16xf32> to vector<16x1xf32>
    %cst_45 = arith.constant 3.200000e+01 : f32
    %131 = vector.broadcast %cst_45 : f32 to vector<16x1xf32>
    %132 = arith.divf %130, %131 : vector<16x1xf32>
    %cst_46 = arith.constant 9.99999974E-6 : f32
    %133 = vector.broadcast %cst_46 : f32 to vector<16x1xf32>
    %134 = arith.addf %132, %133 : vector<16x1xf32>
    %135 = math.rsqrt %134 : vector<16x1xf32>
    %136 = vector.broadcast %135 : vector<16x1xf32> to vector<16x32xf32>
    %137 = arith.mulf %127, %136 : vector<16x32xf32>
    %c0_47 = arith.constant 0 : index
    %c0_48 = arith.constant 0 : index
    %138 = vector.load %arg8[%c0_47, %c0_48] : memref<1x32xf32, #tpu.memory_space<vmem>>, vector<1x32xf32>
    %139 = vector.shape_cast %138 : vector<1x32xf32> to vector<32xf32>
    %140 = vector.shape_cast %139 : vector<32xf32> to vector<1x32xf32>
    %141 = vector.broadcast %140 : vector<1x32xf32> to vector<16x32xf32>
    %142 = arith.mulf %137, %141 : vector<16x32xf32>
    %c0_49 = arith.constant 0 : index
    %c0_50 = arith.constant 0 : index
    %143 = vector.load %arg9[%c0_49, %c0_50] : memref<1x32xf32, #tpu.memory_space<vmem>>, vector<1x32xf32>
    %144 = vector.shape_cast %143 : vector<1x32xf32> to vector<32xf32>
    %145 = vector.shape_cast %144 : vector<32xf32> to vector<1x32xf32>
    %146 = vector.broadcast %145 : vector<1x32xf32> to vector<16x32xf32>
    %147 = arith.addf %142, %146 : vector<16x32xf32>
    %c0_51 = arith.constant 0 : index
    %c0_52 = arith.constant 0 : index
    %148 = vector.load %arg10[%c0_51, %c0_52] : memref<32x64xf32, #tpu.memory_space<vmem>>, vector<32x64xf32>
    %cst_53 = arith.constant dense<0.000000e+00> : vector<16x64xf32>
    %149 = tpu.matmul %147, %148, %cst_53 {dimension_numbers = #tpu.dot_dimension_numbers<[1], [0], [0], [1], [0, 0, 1, 1], [], []>} : vector<16x32xf32>, vector<32x64xf32>, vector<16x64xf32> -> vector<16x64xf32>
    %c0_54 = arith.constant 0 : index
    %c0_55 = arith.constant 0 : index
    %150 = vector.load %arg11[%c0_54, %c0_55] : memref<1x64xf32, #tpu.memory_space<vmem>>, vector<1x64xf32>
    %151 = vector.shape_cast %150 : vector<1x64xf32> to vector<64xf32>
    %152 = vector.shape_cast %151 : vector<64xf32> to vector<1x64xf32>
    %153 = vector.broadcast %152 : vector<1x64xf32> to vector<16x64xf32>
    %154 = arith.addf %149, %153 : vector<16x64xf32>
    %cst_56 = arith.constant 5.000000e-01 : f32
    %155 = vector.broadcast %cst_56 : f32 to vector<16x64xf32>
    %156 = arith.mulf %155, %154 : vector<16x64xf32>
    %cst_57 = arith.constant 0.707106769 : f32
    %157 = vector.broadcast %cst_57 : f32 to vector<16x64xf32>
    %158 = arith.mulf %154, %157 : vector<16x64xf32>
    %159 = math.erf %158 : vector<16x64xf32>
    %cst_58 = arith.constant 1.000000e+00 : f32
    %160 = vector.broadcast %cst_58 : f32 to vector<16x64xf32>
    %161 = arith.addf %160, %159 : vector<16x64xf32>
    %162 = arith.mulf %156, %161 : vector<16x64xf32>
    %c0_59 = arith.constant 0 : index
    %c0_60 = arith.constant 0 : index
    %163 = vector.load %arg12[%c0_59, %c0_60] : memref<64x32xf32, #tpu.memory_space<vmem>>, vector<64x32xf32>
    %cst_61 = arith.constant dense<0.000000e+00> : vector<16x32xf32>
    %164 = tpu.matmul %162, %163, %cst_61 {dimension_numbers = #tpu.dot_dimension_numbers<[1], [0], [0], [1], [0, 0, 1, 1], [], []>} : vector<16x64xf32>, vector<64x32xf32>, vector<16x32xf32> -> vector<16x32xf32>
    %c0_62 = arith.constant 0 : index
    %c0_63 = arith.constant 0 : index
    %165 = vector.load %arg13[%c0_62, %c0_63] : memref<1x32xf32, #tpu.memory_space<vmem>>, vector<1x32xf32>
    %166 = vector.shape_cast %165 : vector<1x32xf32> to vector<32xf32>
    %167 = vector.shape_cast %166 : vector<32xf32> to vector<1x32xf32>
    %168 = vector.broadcast %167 : vector<1x32xf32> to vector<16x32xf32>
    %169 = arith.addf %164, %168 : vector<16x32xf32>
    %c0_64 = arith.constant 0 : index
    %c0_65 = arith.constant 0 : index
    %170 = vector.load %arg14[%c0_64, %c0_65] : memref<16x32xf32, #tpu.memory_space<vmem>>, vector<16x32xf32>
    tpu.vector_store %arg14[%c0_64, %c0_65], %169 {strides = array<i32>} : memref<16x32xf32, #tpu.memory_space<vmem>>, vector<16x32xf32>,
    return
  }
  func.func @transform_0(%arg0: i32) -> (i32, i32) {
    %c0_i32 = arith.constant 0 : i32
    %c0_i32_0 = arith.constant 0 : i32
    return %arg0, %c0_i32 : i32, i32
  }
  func.func @transform_1(%arg0: i32) -> (i32, i32) {
    %c0_i32 = arith.constant 0 : i32
    %c0_i32_0 = arith.constant 0 : i32
    %c0_i32_1 = arith.constant 0 : i32
    return %c0_i32, %c0_i32_0 : i32, i32
  }
  func.func @transform_2(%arg0: i32) -> (i32, i32) {
    %c0_i32 = arith.constant 0 : i32
    %c0_i32_0 = arith.constant 0 : i32
    %c0_i32_1 = arith.constant 0 : i32
    return %c0_i32, %c0_i32_0 : i32, i32
  }
  func.func @transform_3(%arg0: i32) -> (i32, i32) {
    %c0_i32 = arith.constant 0 : i32
    %c0_i32_0 = arith.constant 0 : i32
    %c0_i32_1 = arith.constant 0 : i32
    return %c0_i32, %c0_i32_0 : i32, i32
  }
  func.func @transform_4(%arg0: i32) -> (i32, i32) {
    %c0_i32 = arith.constant 0 : i32
    %c0_i32_0 = arith.constant 0 : i32
    %c0_i32_1 = arith.constant 0 : i32
    return %c0_i32, %c0_i32_0 : i32, i32
  }
  func.func @transform_5(%arg0: i32) -> (i32, i32) {
    %c0_i32 = arith.constant 0 : i32
    %c0_i32_0 = arith.constant 0 : i32
    %c0_i32_1 = arith.constant 0 : i32
    return %c0_i32, %c0_i32_0 : i32, i32
  }
  func.func @transform_6(%arg0: i32) -> (i32, i32) {
    %c0_i32 = arith.constant 0 : i32
    %c0_i32_0 = arith.constant 0 : i32
    %c0_i32_1 = arith.constant 0 : i32
    return %c0_i32, %c0_i32_0 : i32, i32
  }
  func.func @transform_7(%arg0: i32) -> (i32, i32) {
    %c0_i32 = arith.constant 0 : i32
    %c0_i32_0 = arith.constant 0 : i32
    %c0_i32_1 = arith.constant 0 : i32
    return %c0_i32, %c0_i32_0 : i32, i32
  }
  func.func @transform_8(%arg0: i32) -> (i32, i32) {
    %c0_i32 = arith.constant 0 : i32
    %c0_i32_0 = arith.constant 0 : i32
    %c0_i32_1 = arith.constant 0 : i32
    return %c0_i32, %c0_i32_0 : i32, i32
  }
  func.func @transform_9(%arg0: i32) -> (i32, i32) {
    %c0_i32 = arith.constant 0 : i32
    %c0_i32_0 = arith.constant 0 : i32
    %c0_i32_1 = arith.constant 0 : i32
    return %c0_i32, %c0_i32_0 : i32, i32
  }
  func.func @transform_10(%arg0: i32) -> (i32, i32) {
    %c0_i32 = arith.constant 0 : i32
    %c0_i32_0 = arith.constant 0 : i32
    %c0_i32_1 = arith.constant 0 : i32
    return %c0_i32, %c0_i32_0 : i32, i32
  }
  func.func @transform_11(%arg0: i32) -> (i32, i32) {
    %c0_i32 = arith.constant 0 : i32
    %c0_i32_0 = arith.constant 0 : i32
    %c0_i32_1 = arith.constant 0 : i32
    return %c0_i32, %c0_i32_0 : i32, i32
  }
  func.func @transform_12(%arg0: i32) -> (i32, i32) {
    %c0_i32 = arith.constant 0 : i32
    %c0_i32_0 = arith.constant 0 : i32
    %c0_i32_1 = arith.constant 0 : i32
    return %c0_i32, %c0_i32_0 : i32, i32
  }
  func.func @transform_13(%arg0: i32) -> (i32, i32) {
    %c0_i32 = arith.constant 0 : i32
    %c0_i32_0 = arith.constant 0 : i32
    return %arg0, %c0_i32 : i32, i32
  }
}

</mosaic_0001>

<bundles_post_ra>
// kernel: tpu_custom_call.1
= control target key start
LH: loop header
LB: loop body
LE: loop exit
PB: predicated region body
PF: predicated region fallthrough
CT: control target
= control target key end

     0   :  { %18 = vsyncpa [#allocation4], 0  ;;  %s1652_s0 = inlined_call_operand.hbm [shape: f32[16,32], index: 0, kind: input, shape index: {}]   ;;  %s1653_s1 = inlined_call_operand.hbm [shape: f32[1,32], index: 1, kind: input, shape index: {}]   ;;  %s1654_s2 = inlined_call_operand.vmem [shape: f32[1,32], index: 2, kind: input, shape index: {}]   ;;  %s1655_s3 = inlined_call_operand.vmem [shape: f32[32,96], index: 3, kind: input, shape index: {}]   ;;  %s1656_s4 = inlined_call_operand.vmem [shape: f32[1,96], index: 4, kind: input, shape index: {}]   ;;  %s1657_s5 = inlined_call_operand.vmem [shape: f32[32,32], index: 5, kind: input, shape index: {}]   ;;  %s1658_s6 = inlined_call_operand.vmem [shape: f32[1,32], index: 6, kind: input, shape index: {}]   ;;  %s1659_s7 = inlined_call_operand.vmem [shape: f32[1,32], index: 7, kind: input, shape index: {}]   ;;  %s1660_s8 = inlined_call_operand.vmem [shape: f32[1,32], index: 8, kind: input, shape index: {}]   ;;  %s1661_s9 = inlined_call_operand.vmem [shape: f32[32,64], index: 9, kind: input, shape index: {}]   ;;  %s1662_s10 = inlined_call_operand.vmem [shape: f32[1,64], index: 10, kind: input, shape index: {}]   ;;  %s1663_s11 = inlined_call_operand.vmem [shape: f32[64,32], index: 11, kind: input, shape index: {}]   ;;  %s1664_s12 = inlined_call_operand.vmem [shape: f32[1,32], index: 12, kind: input, shape index: {}]   ;;  %s1665_s13 = inlined_call_operand.hbm [shape: f32[16,32], index: 13, kind: output, shape index: {}]  }
   0x1   :  { %19 = vsyncpa [#allocation7], 0 }
   0x2   :  { %20 = vsyncpa [#allocation5], 0  ;;  %s25_s27 = sshll.u32 %s1652_s0, 4  ;;  %s1305_s28 = smov [#allocation3]   ;;  %s26_s27 = int_to_ptr.hbm [resolvable:$true] %s25_s27 }
   0x3   :  { %s27_s29 = sshll.u32 %s1305_s28, 4  ;;  %s39_s15 = sshll.u32 %s1653_s1, 4  ;;  %s28_s29 = int_to_ptr.vmem [resolvable:$true] %s27_s29  ;;  %s40_s15 = int_to_ptr.hbm [resolvable:$true] %s39_s15 }
   0x4   :  { %s1306_s16 = smov 128   ;;  %s1307_s17 = smov 8  }
   0x5   :  { %33 = dma.hbm_to_vmem [thread:$0]  %s26_s27, 256, %s28_s29, [#allocation4], %s1306_s16, %s1306_s16, %s1307_s17  }
   0x6   :  { %s1308_s18 = smov [#allocation6]  }
   0x7   :  { %s41_s19 = sshll.u32 %s1308_s18, 4  ;;  %s42_s19 = int_to_ptr.vmem [resolvable:$true] %s41_s19 }
   0x8   :  { %44 = dma.hbm_to_vmem [thread:$0]  %s40_s15, 16, %s42_s19, [#allocation7]  }
   0x9   :  { %1299 = dma.done.wait [#allocation4], 256  }
   0xa   :  { %1300 = vsyncadd [#allocation4], 4294967040 }
   0xb   :  { %1301 = dma.done.wait [#allocation7], 16  }
   0xc   :  { %1302 = vsyncadd [#allocation7], 4294967280  ;;  %vm77_vm0 = vcmask 261120   ;;  %v75_v0 = vld [vmem:[#allocation3] sm:$0xff]  ;;  %v76_v1 = vld [vmem:[#allocation3 + $0x8] sm:$0xff]  ;;  %v1309_v4 = vmov 32.0  }
   0xd   :  { %v78_v2 = vsel %vm77_vm0, %v75_v0, 0.0  ;;  %v81_v3 = vsel %vm77_vm0, %v76_v1, 0.0  ;;  %1181 = vrcp.f32 %v1309_v4  ;;  %v144_v21 = vld [vmem:[%s1655_s3 + $0x18] sm:$0xff]  ;;  %v143_v22 = vld [vmem:[%s1655_s3 + $0x10] sm:$0xff]  ;;  %v142_v23 = vld [vmem:[%s1655_s3 + $0x8] sm:$0xff]  ;;  %s1310_s29 = smov 64  }
   0xe   :  { %79 = vadd.xlane.f32.xlu0 %v78_v2  ;;  %82 = vadd.xlane.f32.xlu1 %v81_v3  ;;  %v141_v24 = vld [vmem:[%s1655_s3] sm:$0xff]  ;;  %s1312_s30 = smov 80   ;;  %s1313_s14 = smov 88   ;;  %vm181_vm8 = vcmask 64512  }
   0xf   :  { %167 = vmatpush.msra.mxu0 %v144_v21  ;;  %v1173_v43 = vld [vmem:[#allocation6] ss:$0 sm:$0xff]  ;;  %s1315_s15 = smov 104   ;;  %s1316_s18 = smov 120  }
  0x10   :  { %v1174_v47 = vld [vmem:[%s1654_s2] ss:$0 sm:$0xff]  ;;  %s1311_s2 = smov 96   ;;  %s1317_s19 = smov 72  }
  0x11   :  { %168 = vmatpush.msra.mxu0 %v143_v22  ;;  %v1175_v53 = vld [vmem:[%s1656_s4] ss:$0 sm:$0xff]  ;;  %s1314_s4 = smov 112   ;;  %s1318_s0 = smov 56  }
  0x12   :  { %s1319_s1 = smov 48   ;;  %s1320_s20 = smov 40  }
  0x13   :  { %v1182_v5 = vpop.eup %1181  ;;  %169 = vmatpush.msra.mxu0 %v142_v23  ;;  %s1321_s21 = smov 16   ;;  %s1322_s22 = smov 24  }
  0x14   :  { %v85_v6 = vmul.f32 32.0, %v1182_v5  ;;  %vm89_vm1 = vweird.f32 %v1182_v5 }
  0x15   :  { %170 = vmatpush.msra.mxu0 %v141_v24 }
  0x16   :  { %v86_v7 = vsub.f32 1.0, %v85_v6 }
  0x18   :  { %v87_v8 = vmul.f32 %v1182_v5, %v86_v7 }
  0x1a   :  { %v88_v9 = vadd.f32 %v1182_v5, %v87_v8 }
  0x1c   :  { %v1405_v10 = vsel %vm89_vm1, %v1182_v5, %v88_v9 }
  0x81   :  { %v80_v11 = vpop.xlane.xlu0 %79  ;;  %v83_v12 = vpop.xlane.xlu1 %82 }
  0x82   :  { %v91_v13 = vmul.f32 %v1405_v10, %v80_v11  ;;  %v92_v14 = vmul.f32 %v1405_v10, %v83_v12 }
  0x84   :  { %v93_v15 = vsub.f32 %v75_v0, %v91_v13  ;;  %v94_v16 = vsub.f32 %v76_v1, %v92_v14 }
  0x86   :  { %v95_v17 = vmul.f32 %v93_v15, %v93_v15  ;;  %v96_v18 = vmul.f32 %v94_v16, %v94_v16 }
  0x88   :  { %v97_v19 = vsel %vm77_vm0, %v95_v17, 0.0  ;;  %v100_v20 = vsel %vm77_vm0, %v96_v18, 0.0 }
  0x89   :  { %98 = vadd.xlane.f32.xlu0 %v97_v19  ;;  %101 = vadd.xlane.f32.xlu2 %v100_v20 }
  0xfc   :  { %v99_v25 = vpop.xlane.xlu0 %98  ;;  %v102_v26 = vpop.xlane.xlu2 %101 }
  0xfd   :  { %v103_v27 = vmul.f32 %v99_v25, %v1405_v10  ;;  %v104_v28 = vmul.f32 %v102_v26, %v1405_v10 }
  0xff   :  { %v105_v29 = vadd.f32 1e-05, %v103_v27  ;;  %v106_v30 = vadd.f32 1e-05, %v104_v28 }
 0x101   :  { %1183 = vrsqrt.f32 %v105_v29  ;;  %vm123_vm2 = vweird.f32 %v106_v30  ;;  %vm113_vm5 = vweird.f32 %v105_v29 }
 0x102   :  { %1185 = vrsqrt.f32 %v106_v30 }
 0x107   :  { %v1184_v31 = vpop.eup %1183 }
 0x108   :  { %v1186_v32 = vpop.eup %1185  ;;  %v108_v33 = vmul.f32 %v1184_v31, %v105_v29  ;;  %vm114_vm4 = vweird.f32 %v1184_v31 }
 0x109   :  { %v118_v34 = vmul.f32 %v1186_v32, %v106_v30  ;;  %vm124_vm3 = vweird.f32 %v1186_v32  ;;  %vm115_vm7 = vmor %vm113_vm5, %vm114_vm4 }
 0x10a   :  { %v109_v35 = vmul.f32 %v1184_v31, %v108_v33  ;;  %vm125_vm6 = vmor %vm123_vm2, %vm124_vm3 }
 0x10b   :  { %v119_v36 = vmul.f32 %v1186_v32, %v118_v34 }
 0x10c   :  { %v110_v37 = vmul.f32 0.5, %v109_v35 }
 0x10d   :  { %v120_v38 = vmul.f32 0.5, %v119_v36 }
 0x10e   :  { %v111_v39 = vsub.f32 1.5, %v110_v37 }
 0x10f   :  { %v121_v40 = vsub.f32 1.5, %v120_v38 }
 0x110   :  { %v112_v41 = vmul.f32 %v1184_v31, %v111_v39 }
 0x111   :  { %v122_v42 = vmul.f32 %v1186_v32, %v121_v40 }
 0x112   :  { %v116_v44 = vsel %vm115_vm7, %v1184_v31, %v112_v41 }
 0x113   :  { %v126_v45 = vsel %vm125_vm6, %v1186_v32, %v122_v42  ;;  %v127_v46 = vmul.f32 %v116_v44, %v93_v15 }
 0x114   :  { %v128_v49 = vmul.f32 %v126_v45, %v94_v16 }
 0x115   :  { %v133_v48 = vmul.f32 %v1173_v43, %v127_v46 }
 0x116   :  { %v134_v51 = vmul.f32 %v1173_v43, %v128_v49 }
 0x117   :  { %v139_v50 = vadd.f32 %v1174_v47, %v133_v48 }
 0x118   :  { %v140_v52 = vadd.f32 %v1174_v47, %v134_v51 }
 0x119   :  { %1120 = vmatmul.msk.f32.vlgmr.msra.gmra.mxu0 %vm77_vm0, %v139_v50 }
 0x121   :  { %1121 = vmatmul.msk.f32.gmra.mxu0 %vm77_vm0, %v140_v52 }
 0x196   :  { %v172_v54 = vpop.f32.mrf.mxu0 }
 0x197   :  { %v1433_v55 = vadd.f32 %v1175_v53, %v172_v54 }
 0x199   :  { %281 = vrot.lane.b32.xlu0 %v1433_v55, %s1310_s29  ;;  %179 = vrot.lane.b32.xlu1 %v1433_v55, %s1311_s2 }
 0x19e   :  { %v175_v56 = vpop.f32.mrf.mxu0 }
 0x19f   :  { %v1438_v57 = vadd.f32 %v1175_v53, %v175_v56 }
 0x1a1   :  { %504 = vrot.lane.b32.xlu0 %v1433_v55, %s1312_s30  ;;  %365 = vrot.lane.b32.xlu1 %v1438_v57, %s1313_s14 }
 0x1a9   :  { %337 = vrot.lane.b32.xlu1 %v1433_v55, %s1313_s14 }
 0x1b1   :  { %502 = vrot.lane.b32.xlu1 %v1433_v55, %s1314_s4 }
 0x1b9   :  { %532 = vrot.lane.b32.xlu1 %v1438_v57, %s1312_s30 }
 0x1c1   :  { %697 = vrot.lane.b32.xlu1 %v1438_v57, %s1315_s15 }
 0x20b   :  { %v282_v58 = vpop.permute.xlu0 %281  ;;  %v180_v59 = vpop.permute.xlu1 %179 }
 0x20c   :  { %1122 = vmatpush.xpose.msk.msra.mxu1 %vm181_vm8, %v180_v59 }
 0x20f   :  { %1123 = vmatmul.msk.f32.vlgmr.msra.gmra.mxu1 %vm181_vm8, %v1433_v55 }
 0x210   :  { %302 = vmatpush.msrb.mxu1 %v282_v58 }
 0x213   :  { %v366_v60 = vpop.permute.xlu1 %365  ;;  %v505_v7 = vpop.permute.xlu0 %504 }
 0x21b   :  { %v338_v61 = vpop.permute.xlu1 %337 }
 0x21c   :  { %1128 = vmatpush.xpose.msk.msra.mxu1 %vm181_vm8, %v338_v61 }
 0x223   :  { %v503_v0 = vpop.permute.xlu1 %502 }
 0x22b   :  { %v533_v1 = vpop.permute.xlu1 %532 }
 0x22c   :  { %1136 = vmatpush.xpose.msk.msrb.mxu0 %vm181_vm8, %v533_v1 }
 0x233   :  { %v698_v34 = vpop.permute.xlu1 %697 }
 0x28c   :  { %v203_v62 = vpop.f32.mrf.mxu1 }
 0x28d   :  { %v233_v63 = vsel %vm181_vm8, %v203_v62, -inf }
 0x28e   :  { %234 = vmax.xlane.f32.xlu2 %v233_v63 }
 0x2a6   :  { %207 = vrot.lane.b32.xlu2 %v1438_v57, %s1311_s2 }
 0x2ae   :  { %363 = vrot.lane.b32.xlu2 %v1438_v57, %s1316_s18 }
 0x2b6   :  { %335 = vrot.lane.b32.xlu2 %v1433_v55, %s1316_s18  ;;  %s1323_s18 = smov [#allocation8]  }
 0x2be   :  { %669 = vrot.lane.b32.xlu2 %v1433_v55, %s1315_s15 }
 0x2c6   :  { %699 = vrot.lane.b32.xlu2 %v1438_v57, %s1317_s19 }
 0x301   :  { %v235_v2 = vpop.xlane.xlu2 %234 }
 0x302   :  { %v239_v3 = vsub.f32 %v203_v62, %v235_v2 }
 0x304   :  { %v241_v4 = vmul.f32 1.442695, %v239_v3 }
 0x306   :  { %1187 = vpow2.f32 %v241_v4 }
 0x309   :  { %v208_v5 = vpop.permute.xlu2 %207 }
 0x30a   :  { %1124 = vmatpush.xpose.msk.msra.mxu2 %vm181_vm8, %v208_v5 }
 0x30c   :  { %v1188_v6 = vpop.eup %1187 }
 0x30d   :  { %1125 = vmatmul.msk.f32.vlgmr.msra.gmra.mxu2 %vm181_vm8, %v1438_v57  ;;  %v245_v8 = vsel %vm181_vm8, %v1188_v6, 0.0 }
 0x30e   :  { %1130 = vmatpush.xpose.msk.msrb.mxu2 %vm181_vm8, %v366_v60  ;;  %246 = vadd.xlane.f32.xlu0 %v245_v8 }
 0x311   :  { %v364_v9 = vpop.permute.xlu2 %363 }
 0x312   :  { %1134 = vmatpush.xpose.msk.msra.mxu2 %vm181_vm8, %v505_v7 }
 0x315   :  { %1131 = vmatmul.msk.f32.vlgmr.msrb.gmra.mxu2 %vm181_vm8, %v364_v9 }
 0x319   :  { %v336_v11 = vpop.permute.xlu2 %335 }
 0x31d   :  { %1135 = vmatmul.msk.f32.vlgmr.msra.gmra.mxu2 %vm181_vm8, %v503_v0 }
 0x321   :  { %v670_v12 = vpop.permute.xlu2 %669 }
 0x322   :  { %671 = vrot.lane.b32.xlu0 %v1433_v55, %s1317_s19  ;;  %s1104_s19 = sshll.u32 %s1323_s18, 4  ;;  %s1105_s19 = int_to_ptr.vmem [resolvable:$true] %s1104_s19 }
 0x329   :  { %v700_v13 = vpop.permute.xlu2 %699 }
 0x32a   :  { %530 = vrot.lane.b32.xlu0 %v1438_v57, %s1314_s4  ;;  %1142 = vmatpush.xpose.msk.msra.mxu0 %vm181_vm8, %v700_v13 }
 0x381   :  { %v247_v14 = vpop.xlane.xlu0 %246 }
 0x382   :  { %1189 = vrcp.f32 %v247_v14  ;;  %v262_v18 = vand.u32 2147483648, %v247_v14  ;;  %v260_v20 = vand.u32 2147483647, %v247_v14  ;;  %vm256_vm10 = vweird.f32 %v247_v14 }
 0x384   :  { %v263_v22 = vor.u32 1.1754944e-38, %v262_v18  ;;  %vm261_vm12 = vcmp.eq.f32.partialorder %v260_v20, 8.507059e+37 }
 0x388   :  { %v1190_v15 = vpop.eup %1189 }
 0x389   :  { %v252_v16 = vmul.f32 %v1190_v15, %v247_v14  ;;  %vm257_vm9 = vweird.f32 %v1190_v15 }
 0x38a   :  { %vm258_vm11 = vmor %vm256_vm10, %vm257_vm9 }
 0x38b   :  { %v253_v17 = vsub.f32 1.0, %v252_v16 }
 0x38d   :  { %v254_v19 = vmul.f32 %v1190_v15, %v253_v17 }
 0x38f   :  { %v255_v21 = vadd.f32 %v1190_v15, %v254_v19 }
 0x390   :  { %v230_v23 = vpop.f32.mrf.mxu2 }
 0x391   :  { %v236_v24 = vsel %vm181_vm8, %v230_v23, -inf  ;;  %v259_v25 = vsel %vm258_vm11, %v1190_v15, %v255_v21 }
 0x392   :  { %237 = vmax.xlane.f32.xlu0 %v236_v24  ;;  %v264_v26 = vsel %vm261_vm12, %v263_v22, %v259_v25 }
 0x393   :  { %v279_v27 = vmul.f32 %v1188_v6, %v264_v26 }
 0x394   :  { %v672_v28 = vpop.permute.xlu0 %671 }
 0x395   :  { %1126 = vmatmul.msk.f32.vlgmr.msrb.gmra.mxu1 %vm181_vm8, %v279_v27  ;;  %1140 = vmatpush.xpose.msk.msrb.mxu2 %vm181_vm8, %v672_v28 }
 0x398   :  { %v388_v29 = vpop.f32.mrf.mxu2  ;;  %1141 = vmatmul.msk.f32.vlgmr.msrb.gmra.mxu2 %vm181_vm8, %v670_v12 }
 0x399   :  { %v394_v30 = vsel %vm181_vm8, %v388_v29, -inf }
 0x39a   :  { %395 = vmax.xlane.f32.xlu0 %v394_v30 }
 0x39c   :  { %v531_v31 = vpop.permute.xlu0 %530 }
 0x39d   :  { %1129 = vmatmul.msk.f32.vlgmr.msra.gmra.mxu1 %vm181_vm8, %v336_v11  ;;  %1137 = vmatmul.msk.f32.vlgmr.msrb.gmra.mxu0 %vm181_vm8, %v531_v31 }
 0x3a0   :  { %v527_v32 = vpop.f32.mrf.mxu2 }
 0x3a1   :  { %v558_v33 = vsel %vm181_vm8, %v527_v32, -inf }
 0x3a2   :  { %559 = vmax.xlane.f32.xlu1 %v558_v33 }
 0x3a5   :  { %1143 = vmatmul.msk.f32.vlgmr.msra.gmra.mxu0 %vm181_vm8, %v698_v34 }
 0x405   :  { %v238_v35 = vpop.xlane.xlu0 %237 }
 0x406   :  { %v240_v41 = vsub.f32 %v230_v23, %v238_v35 }
 0x408   :  { %v243_v47 = vmul.f32 1.442695, %v240_v41 }
 0x40d   :  { %v396_v36 = vpop.xlane.xlu0 %395 }
 0x40e   :  { %v398_v37 = vsub.f32 %v388_v29, %v396_v36 }
 0x410   :  { %v401_v39 = vmul.f32 1.442695, %v398_v37 }
 0x412   :  { %v304_v38 = vpop.f32.mrf.mxu1  ;;  %1191 = vpow2.f32 %v401_v39 }
 0x413   :  { %333 = vst.msk [vmem:[#allocation2] sm:$0xff] %vm181_vm8, %v304_v38  ;;  %1193 = vpow2.f32 %v243_v47 }
 0x415   :  { %v560_v40 = vpop.xlane.xlu1 %559 }
 0x416   :  { %v564_v44 = vsub.f32 %v527_v32, %v560_v40 }
 0x418   :  { %v566_v48 = vmul.f32 1.442695, %v564_v44  ;;  %v1482_v49 = vpop.eup %1191 }
 0x419   :  { %v406_v53 = vsel %vm181_vm8, %v1482_v49, 0.0  ;;  %v1488_v56 = vpop.eup %1193 }
 0x41a   :  { %v360_v42 = vpop.f32.mrf.mxu1  ;;  %v555_v43 = vpop.f32.mrf.mxu0  ;;  %1195 = vpow2.f32 %v566_v48  ;;  %v248_v59 = vsel %vm181_vm8, %v1488_v56, 0.0 }
 0x41b   :  { %v391_v45 = vsel %vm181_vm8, %v360_v42, -inf  ;;  %v561_v46 = vsel %vm181_vm8, %v555_v43, -inf  ;;  %v694_v50 = vpop.f32.mrf.mxu2 }
 0x41c   :  { %392 = vmax.xlane.f32.xlu2 %v391_v45  ;;  %562 = vmax.xlane.f32.xlu1 %v561_v46  ;;  %v725_v52 = vsel %vm181_vm8, %v694_v50, -inf }
 0x420   :  { %v1490_v58 = vpop.eup %1195 }
 0x421   :  { %v570_v60 = vsel %vm181_vm8, %v1490_v58, 0.0 }
 0x422   :  { %v722_v51 = vpop.f32.mrf.mxu0 }
 0x423   :  { %v728_v54 = vsel %vm181_vm8, %v722_v51, -inf }
 0x424   :  { %726 = vmax.xlane.f32.xlu2 %v725_v52  ;;  %407 = vadd.xlane.f32.xlu1 %v406_v53 }
 0x425   :  { %729 = vmax.xlane.f32.xlu0 %v728_v54 }
 0x42c   :  { %249 = vadd.xlane.f32.xlu2 %v248_v59 }
 0x42d   :  { %571 = vadd.xlane.f32.xlu0 %v570_v60 }
 0x43d   :  { %439 = vrot.lane.b32.xlu1 %v1433_v55, %s1318_s0 }
 0x444   :  { %307 = vrot.lane.b32.xlu2 %v1438_v57, %s1310_s29 }
 0x445   :  { %465 = vrot.lane.b32.xlu1 %v1438_v57, %s1318_s0 }
 0x48f   :  { %v393_v61 = vpop.xlane.xlu2 %392  ;;  %v563_v62 = vpop.xlane.xlu1 %562 }
 0x490   :  { %v397_v63 = vsub.f32 %v360_v42, %v393_v61  ;;  %v565_v7 = vsub.f32 %v555_v43, %v563_v62 }
 0x492   :  { %v399_v0 = vmul.f32 1.442695, %v397_v63  ;;  %v568_v13 = vmul.f32 1.442695, %v565_v7 }
 0x494   :  { %1197 = vpow2.f32 %v399_v0 }
 0x497   :  { %v727_v1 = vpop.xlane.xlu2 %726  ;;  %v408_v2 = vpop.xlane.xlu1 %407 }
 0x498   :  { %v731_v3 = vsub.f32 %v694_v50, %v727_v1  ;;  %v730_v4 = vpop.xlane.xlu0 %729  ;;  %1199 = vrcp.f32 %v408_v2  ;;  %v434_v33 = vand.u32 2147483648, %v408_v2  ;;  %vm428_vm2 = vweird.f32 %v408_v2 }
 0x499   :  { %v732_v5 = vsub.f32 %v722_v51, %v730_v4  ;;  %v432_v35 = vand.u32 2147483647, %v408_v2 }
 0x49a   :  { %v1500_v6 = vpop.eup %1197  ;;  %v733_v8 = vmul.f32 1.442695, %v731_v3  ;;  %v435_v41 = vor.u32 1.1754944e-38, %v434_v33 }
 0x49b   :  { %v735_v9 = vmul.f32 1.442695, %v732_v5  ;;  %v403_v11 = vsel %vm181_vm8, %v1500_v6, 0.0  ;;  %vm433_vm5 = vcmp.eq.f32.partialorder %v432_v35, 8.507059e+37 }
 0x49c   :  { %1201 = vpow2.f32 %v733_v8  ;;  %404 = vadd.xlane.f32.xlu1 %v403_v11 }
 0x49d   :  { %1203 = vpow2.f32 %v735_v9 }
 0x49e   :  { %v1200_v12 = vpop.eup %1199 }
 0x49f   :  { %v250_v14 = vpop.xlane.xlu2 %249  ;;  %v424_v15 = vmul.f32 %v1200_v12, %v408_v2  ;;  %vm429_vm14 = vweird.f32 %v1200_v12 }
 0x4a0   :  { %1205 = vrcp.f32 %v250_v14  ;;  %v276_v27 = vand.u32 2147483648, %v250_v14  ;;  %v274_v30 = vand.u32 2147483647, %v250_v14  ;;  %vm270_vm15 = vweird.f32 %v250_v14  ;;  %vm430_vm4 = vmor %vm428_vm2, %vm429_vm14  ;;  %v572_v45 = vpop.xlane.xlu0 %571 }
 0x4a1   :  { %1207 = vpow2.f32 %v568_v13  ;;  %v425_v20 = vsub.f32 1.0, %v424_v15  ;;  %vm581_vm12 = vweird.f32 %v572_v45 }
 0x4a2   :  { %v1504_v16 = vpop.eup %1201  ;;  %v277_v34 = vor.u32 1.1754944e-38, %v276_v27  ;;  %vm275_vm3 = vcmp.eq.f32.partialorder %v274_v30, 8.507059e+37 }
 0x4a3   :  { %v1506_v17 = vpop.eup %1203  ;;  %v737_v18 = vsel %vm181_vm8, %v1504_v16, 0.0  ;;  %v426_v25 = vmul.f32 %v1200_v12, %v425_v20 }
 0x4a4   :  { %v740_v19 = vsel %vm181_vm8, %v1506_v17, 0.0  ;;  %738 = vadd.xlane.f32.xlu0 %v737_v18 }
 0x4a5   :  { %741 = vadd.xlane.f32.xlu2 %v740_v19  ;;  %v427_v31 = vadd.f32 %v1200_v12, %v426_v25 }
 0x4a6   :  { %v1206_v21 = vpop.eup %1205 }
 0x4a7   :  { %v266_v22 = vmul.f32 %v1206_v21, %v250_v14  ;;  %v308_v23 = vpop.permute.xlu2 %307  ;;  %v1512_v24 = vpop.eup %1207  ;;  %vm271_vm13 = vweird.f32 %v1206_v21  ;;  %v431_v39 = vsel %vm430_vm4, %v1200_v12, %v427_v31  ;;  %v587_v12 = vand.u32 2147483648, %v572_v45 }
 0x4a8   :  { %328 = vmatpush.msra.mxu3 %v308_v23  ;;  %v573_v29 = vsel %vm181_vm8, %v1512_v24, 0.0  ;;  %vm272_vm1 = vmor %vm270_vm15, %vm271_vm13  ;;  %v436_v42 = vsel %vm433_vm5, %v435_v41, %v431_v39  ;;  %v585_v14 = vand.u32 2147483647, %v572_v45 }
 0x4a9   :  { %v267_v26 = vsub.f32 1.0, %v266_v22  ;;  %v438_v44 = vmul.f32 %v1482_v49, %v436_v42  ;;  %v588_v22 = vor.u32 1.1754944e-38, %v587_v12 }
 0x4ab   :  { %v268_v28 = vmul.f32 %v1206_v21, %v267_v26 }
 0x4ac   :  { %574 = vadd.xlane.f32.xlu0 %v573_v29 }
 0x4ad   :  { %v269_v32 = vadd.f32 %v1206_v21, %v268_v28 }
 0x4af   :  { %v440_v36 = vpop.permute.xlu1 %439  ;;  %v273_v37 = vsel %vm272_vm1, %v1206_v21, %v269_v32  ;;  %vm586_vm1 = vcmp.eq.f32.partialorder %v585_v14, 8.507059e+37 }
 0x4b0   :  { %460 = vmatpush.msrb.mxu3 %v440_v36  ;;  %v278_v38 = vsel %vm275_vm3, %v277_v34, %v273_v37 }
 0x4b1   :  { %v280_v40 = vmul.f32 %v1488_v56, %v278_v38 }
 0x4b3   :  { %1127 = vmatmul.msk.f32.vlgmr.msra.gmra.mxu3 %vm181_vm8, %v280_v40 }
 0x4b5   :  { %632 = vrot.lane.b32.xlu1 %v1438_v57, %s1319_s1 }
 0x4b7   :  { %v466_v43 = vpop.permute.xlu1 %465 }
 0x4b8   :  { %486 = vmatpush.msrb.mxu1 %v466_v43 }
 0x4b9   :  { %1133 = vmatmul.msk.f32.vlgmr.msrb.gmra.mxu1 %vm181_vm8, %v438_v44 }
 0x4c0   :  { %606 = vrot.lane.b32.xlu0 %v1433_v55, %s1319_s1  ;;  %s1106_s1 = sshll.u32 %s1665_s13, 4  ;;  %s1107_s1 = int_to_ptr.hbm [resolvable:$true] %s1106_s1 }
 0x4c8   :  { %773 = vrot.lane.b32.xlu0 %v1433_v55, %s1320_s20 }
 0x4d0   :  { %799 = vrot.lane.b32.xlu0 %v1438_v57, %s1320_s20 }
 0x50f   :  { %v405_v46 = vpop.xlane.xlu1 %404 }
 0x510   :  { %1209 = vrcp.f32 %v405_v46  ;;  %v420_v53 = vand.u32 2147483648, %v405_v46  ;;  %v418_v56 = vand.u32 2147483647, %v405_v46  ;;  %vm414_vm7 = vweird.f32 %v405_v46 }
 0x511   :  { %1211 = vrcp.f32 %v572_v45 }
 0x512   :  { %v421_v57 = vor.u32 1.1754944e-38, %v420_v53  ;;  %vm419_vm10 = vcmp.eq.f32.partialorder %v418_v56, 8.507059e+37  ;;  %v839_v56 = vld [vmem:[%s1657_s5 + $0x8] sm:$0xff] }
 0x516   :  { %v1210_v47 = vpop.eup %1209 }
 0x517   :  { %v410_v48 = vmul.f32 %v1210_v47, %v405_v46  ;;  %v1524_v50 = vpop.xlane.xlu0 %738  ;;  %v1212_v51 = vpop.eup %1211  ;;  %vm415_vm6 = vweird.f32 %v1210_v47 }
 0x518   :  { %1213 = vrcp.f32 %v1524_v50  ;;  %v577_v54 = vmul.f32 %v1212_v51, %v572_v45  ;;  %vm416_vm9 = vmor %vm414_vm7, %vm415_vm6  ;;  %v1527_v62 = vpop.xlane.xlu2 %741  ;;  %vm582_vm11 = vweird.f32 %v1212_v51  ;;  %v754_v31 = vand.u32 2147483648, %v1524_v50 }
 0x519   :  { %v411_v49 = vsub.f32 1.0, %v410_v48  ;;  %vm583_vm13 = vmor %vm581_vm12, %vm582_vm11  ;;  %vm748_vm5 = vweird.f32 %v1524_v50  ;;  %v752_v33 = vand.u32 2147483647, %v1524_v50  ;;  %v768_v41 = vand.u32 2147483648, %v1527_v62 }
 0x51a   :  { %v578_v61 = vsub.f32 1.0, %v577_v54  ;;  %v755_v38 = vor.u32 1.1754944e-38, %v754_v31  ;;  %v840_v54 = vld [vmem:[%s1657_s5 + $0x10] sm:$0xff] }
 0x51b   :  { %v412_v52 = vmul.f32 %v1210_v47, %v411_v49  ;;  %vm753_vm7 = vcmp.eq.f32.partialorder %v752_v33, 8.507059e+37  ;;  %v769_v45 = vor.u32 1.1754944e-38, %v768_v41 }
 0x51c   :  { %v579_v2 = vmul.f32 %v1212_v51, %v578_v61 }
 0x51d   :  { %v413_v55 = vadd.f32 %v1210_v47, %v412_v52 }
 0x51e   :  { %v1214_v63 = vpop.eup %1213  ;;  %v580_v8 = vadd.f32 %v1212_v51, %v579_v2  ;;  %v1176_v2 = vld [vmem:[%s1658_s6] ss:$0 sm:$0xff] }
 0x51f   :  { %v575_v59 = vpop.xlane.xlu0 %574  ;;  %v417_v60 = vsel %vm416_vm9, %v1210_v47, %v413_v55  ;;  %v744_v3 = vmul.f32 %v1214_v63, %v1524_v50  ;;  %vm749_vm4 = vweird.f32 %v1214_v63  ;;  %v838_v55 = vld [vmem:[%s1657_s5] sm:$0xff] }
 0x520   :  { %1215 = vrcp.f32 %v575_v59  ;;  %v422_v0 = vsel %vm419_vm10, %v421_v57, %v417_v60  ;;  %v599_v18 = vand.u32 2147483647, %v575_v59  ;;  %v584_v19 = vsel %vm583_vm13, %v1212_v51, %v580_v8  ;;  %vm750_vm6 = vmor %vm748_vm5, %vm749_vm4 }
 0x521   :  { %v437_v1 = vmul.f32 %v1500_v6, %v422_v0  ;;  %1217 = vrcp.f32 %v1527_v62  ;;  %v745_v9 = vsub.f32 1.0, %v744_v3  ;;  %v601_v6 = vand.u32 2147483648, %v575_v59 }
 0x522   :  { %vm595_vm15 = vweird.f32 %v575_v59  ;;  %v589_v26 = vsel %vm586_vm1, %v588_v22, %v584_v19  ;;  %vm600_vm3 = vcmp.eq.f32.partialorder %v599_v18, 8.507059e+37  ;;  %vm762_vm10 = vweird.f32 %v1527_v62  ;;  %v934_v22 = vld [vmem:[%s1661_s9 + $0x18] sm:$0xff] }
 0x523   :  { %1132 = vmatmul.msk.f32.vlgmr.msrb.gmra.mxu3 %vm181_vm8, %v437_v1  ;;  %v746_v21 = vmul.f32 %v1214_v63, %v745_v9  ;;  %v602_v25 = vor.u32 1.1754944e-38, %v601_v6  ;;  %v604_v35 = vmul.f32 %v1490_v58, %v589_v26  ;;  %v766_v58 = vand.u32 2147483647, %v1527_v62  ;;  %957 = vmatpush.msrb.mxu0 %v934_v22  ;;  %v931_v26 = vld [vmem:[%s1661_s9] sm:$0xff]  ;;  %v1057_v22 = vld [vmem:[%s1663_s11 + $0x8] sm:$0xff] }
 0x524   :  { %vm666_vm13 = vcmask 195712  }
 0x525   :  { %v747_v29 = vadd.f32 %v1214_v63, %v746_v21  ;;  %vm767_vm12 = vcmp.eq.f32.partialorder %v766_v58, 8.507059e+37 }
 0x526   :  { %v1216_v4 = vpop.eup %1215 }
 0x527   :  { %v591_v5 = vmul.f32 %v1216_v4, %v575_v59  ;;  %v633_v7 = vpop.permute.xlu1 %632  ;;  %v1218_v11 = vpop.eup %1217  ;;  %vm596_vm14 = vweird.f32 %v1216_v4  ;;  %v751_v37 = vsel %vm750_vm6, %v1214_v63, %v747_v29 }
 0x528   :  { %653 = vmatpush.msra.mxu1 %v633_v7  ;;  %v758_v20 = vmul.f32 %v1218_v11, %v1527_v62  ;;  %vm597_vm2 = vmor %vm595_vm15, %vm596_vm14  ;;  %v756_v40 = vsel %vm753_vm7, %v755_v38, %v751_v37  ;;  %vm763_vm9 = vweird.f32 %v1218_v11  ;;  %vm833_vm14 = vcmask 261312  }
 0x529   :  { %v592_v13 = vsub.f32 1.0, %v591_v5  ;;  %v771_v43 = vmul.f32 %v1504_v16, %v756_v40  ;;  %vm764_vm11 = vmor %vm762_vm10, %vm763_vm9 }
 0x52a   :  { %v759_v28 = vsub.f32 1.0, %v758_v20 }
 0x52b   :  { %v593_v15 = vmul.f32 %v1216_v4, %v592_v13 }
 0x52c   :  { %v760_v36 = vmul.f32 %v1218_v11, %v759_v28 }
 0x52d   :  { %v594_v23 = vadd.f32 %v1216_v4, %v593_v15 }
 0x52f   :  { %v598_v27 = vsel %vm597_vm2, %v1216_v4, %v594_v23  ;;  %v933_v23 = vld [vmem:[%s1661_s9 + $0x10] sm:$0xff] }
 0x530   :  { %v603_v30 = vsel %vm600_vm3, %v602_v25, %v598_v27  ;;  %958 = vmatpush.msrb.mxu0 %v933_v23  ;;  %v932_v25 = vld [vmem:[%s1661_s9 + $0x8] sm:$0xff] }
 0x531   :  { %v605_v32 = vmul.f32 %v1512_v24, %v603_v30  ;;  %v761_v24 = vadd.f32 %v1218_v11, %v760_v36 }
 0x532   :  { %v607_v34 = vpop.permute.xlu0 %606  ;;  %959 = vmatpush.msrb.mxu0 %v932_v25 }
 0x533   :  { %627 = vmatpush.msra.mxu3 %v607_v34  ;;  %1139 = vmatmul.msk.f32.vlgmr.msra.gmra.mxu1 %vm181_vm8, %v605_v32  ;;  %v765_v44 = vsel %vm764_vm11, %v1218_v11, %v761_v24  ;;  %v1177_v24 = vld [vmem:[%s1659_s7] ss:$0 sm:$0xff] }
 0x534   :  { %1138 = vmatmul.msk.f32.vlgmr.msra.gmra.mxu3 %vm181_vm8, %v604_v35  ;;  %v770_v46 = vsel %vm767_vm12, %v769_v45, %v765_v44  ;;  %960 = vmatpush.msrb.mxu0 %v931_v26 }
 0x535   :  { %v772_v48 = vmul.f32 %v1506_v17, %v770_v46  ;;  %v841_v17 = vld [vmem:[%s1657_s5 + $0x18] sm:$0xff] }
 0x536   :  { %v330_v39 = vpop.f32.mrf.mxu3  ;;  %v488_v51 = vpop.f32.mrf.mxu1  ;;  %864 = vmatpush.msra.mxu2 %v841_v17 }
 0x537   :  { %334 = vst.msk [vmem:[#allocation2 + $0x8] sm:$0xff] %vm181_vm8, %v330_v39 }
 0x538   :  { %865 = vmatpush.msra.mxu2 %v840_v54 }
 0x53a   :  { %v774_v42 = vpop.permute.xlu0 %773  ;;  %866 = vmatpush.msra.mxu2 %v839_v56 }
 0x53b   :  { %794 = vmatpush.msrb.mxu3 %v774_v42  ;;  %v1178_v42 = vld [vmem:[%s1660_s8] ss:$0 sm:$0xff] }
 0x53c   :  { %1144 = vmatmul.msk.f32.vlgmr.msrb.gmra.mxu3 %vm181_vm8, %v771_v43  ;;  %867 = vmatpush.msra.mxu2 %v838_v55 }
 0x542   :  { %v800_v47 = vpop.permute.xlu0 %799 }
 0x543   :  { %820 = vmatpush.msrb.mxu1 %v800_v47 }
 0x544   :  { %1145 = vmatmul.msk.f32.vlgmr.msrb.gmra.mxu1 %vm181_vm8, %v772_v48  ;;  %vm499_vm8 = vcmask 130112  }
 0x5a6   :  { %v462_v50 = vpop.f32.mrf.mxu3 }
 0x5a7   :  { %493 = vrot.lane.b32.xlu1 %v462_v50, %s1307_s17 }
 0x5b0   :  { %v655_v49 = vpop.f32.mrf.mxu1 }
 0x5b1   :  { %662 = vrot.lane.b32.xlu2 %v655_v49, %s1321_s21 }
 0x5b7   :  { %v629_v16 = vpop.f32.mrf.mxu3 }
 0x5b8   :  { %660 = vrot.lane.b32.xlu0 %v629_v16, %s1321_s21  ;;  %v1179_v16 = vld [vmem:[%s1662_s10] ss:$0 sm:$0xff] }
 0x5bf   :  { %v796_v52 = vpop.f32.mrf.mxu3 }
 0x5c0   :  { %495 = vrot.lane.b32.xlu0 %v488_v51, %s1307_s17  ;;  %827 = vrot.lane.b32.xlu1 %v796_v52, %s1322_s22 }
 0x5c1   :  { %v822_v53 = vpop.f32.mrf.mxu1 }
 0x5c8   :  { %829 = vrot.lane.b32.xlu1 %v822_v53, %s1322_s22 }
 0x60b   :  { %v663_v62 = vpop.permute.xlu2 %662 }
 0x619   :  { %v494_v57 = vpop.permute.xlu1 %493 }
 0x61a   :  { %500 = vst.msk [vmem:[#allocation2] sm:$0xff] %vm499_vm8, %v494_v57  ;;  %v1063_v57 = vld [vmem:[%s1663_s11 + $0x38] sm:$0xff] }
 0x61b   :  { %1083 = vmatpush.msra.mxu3 %v1063_v57 }
 0x62a   :  { %v661_v59 = vpop.permute.xlu0 %660 }
 0x62b   :  { %667 = vst.msk [vmem:[#allocation2] sm:$0xff] %vm666_vm13, %v661_v59 }
 0x632   :  { %v496_v60 = vpop.permute.xlu0 %495  ;;  %v828_v61 = vpop.permute.xlu1 %827 }
 0x633   :  { %501 = vst.msk [vmem:[#allocation2 + $0x8] sm:$0xff] %vm499_vm8, %v496_v60  ;;  %vm1068_vm8 = vcmask 523264  }
 0x634   :  { %668 = vst.msk [vmem:[#allocation2 + $0x8] sm:$0xff] %vm666_vm13, %v663_v62  ;;  %v1062_v62 = vld [vmem:[%s1663_s11 + $0x30] sm:$0xff] }
 0x635   :  { %834 = vst.msk [vmem:[#allocation2] sm:$0xff] %vm833_vm14, %v828_v61  ;;  %1084 = vmatpush.msra.mxu3 %v1062_v62 }
 0x63a   :  { %v830_v63 = vpop.permute.xlu1 %829 }
 0x63b   :  { %835 = vst.msk [vmem:[#allocation2 + $0x8] sm:$0xff] %vm833_vm14, %v830_v63 }
 0x63c   :  { %v836_v0 = vld [vmem:[#allocation2] sm:$0xff] }
 0x63d   :  { %1146 = vmatmul.msk.f32.vlgmr.msra.gmra.mxu2 %vm77_vm0, %v836_v0 }
 0x642   :  { %v837_v1 = vld [vmem:[#allocation2 + $0x8] sm:$0xff] }
 0x645   :  { %1147 = vmatmul.msk.f32.gmra.mxu2 %vm77_vm0, %v837_v1 }
 0x6c0   :  { %v869_v3 = vpop.f32.mrf.mxu2 }
 0x6c1   :  { %v870_v4 = vadd.f32 %v1176_v2, %v869_v3 }
 0x6c3   :  { %v875_v5 = vsel %vm77_vm0, %v870_v4, 0.0 }
 0x6c4   :  { %876 = vadd.xlane.f32.xlu0 %v875_v5 }
 0x6c8   :  { %v872_v7 = vpop.f32.mrf.mxu2 }
 0x6c9   :  { %v873_v8 = vadd.f32 %v1176_v2, %v872_v7  ;;  %v1061_v2 = vld [vmem:[%s1663_s11 + $0x28] sm:$0xff]  ;;  %v1060_v7 = vld [vmem:[%s1663_s11 + $0x20] sm:$0xff] }
 0x6ca   :  { %1085 = vmatpush.msra.mxu3 %v1061_v2 }
 0x6cb   :  { %v878_v9 = vsel %vm77_vm0, %v873_v8, 0.0 }
 0x6cc   :  { %879 = vadd.xlane.f32.xlu1 %v878_v9  ;;  %1086 = vmatpush.msra.mxu3 %v1060_v7 }
 0x737   :  { %v877_v11 = vpop.xlane.xlu0 %876 }
 0x738   :  { %v881_v12 = vmul.f32 %v877_v11, %v1405_v10 }
 0x73a   :  { %v883_v13 = vsub.f32 %v870_v4, %v881_v12  ;;  %v1059_v12 = vld [vmem:[%s1663_s11 + $0x18] sm:$0xff] }
 0x73b   :  { %1087 = vmatpush.msra.mxu3 %v1059_v12 }
 0x73c   :  { %v885_v14 = vmul.f32 %v883_v13, %v883_v13 }
 0x73e   :  { %v887_v6 = vsel %vm77_vm0, %v885_v14, 0.0 }
 0x73f   :  { %888 = vadd.xlane.f32.xlu2 %v887_v6  ;;  %v880_v15 = vpop.xlane.xlu1 %879 }
 0x740   :  { %v882_v18 = vmul.f32 %v880_v15, %v1405_v10  ;;  %v1058_v15 = vld [vmem:[%s1663_s11 + $0x10] sm:$0xff] }
 0x741   :  { %1088 = vmatpush.msra.mxu3 %v1058_v15 }
 0x742   :  { %v884_v19 = vsub.f32 %v873_v8, %v882_v18 }
 0x743   :  { %1089 = vmatpush.msra.mxu3 %v1057_v22 }
 0x744   :  { %v886_v20 = vmul.f32 %v884_v19, %v884_v19 }
 0x746   :  { %v890_v21 = vsel %vm77_vm0, %v886_v20, 0.0 }
 0x747   :  { %891 = vadd.xlane.f32.xlu0 %v890_v21 }
 0x7b2   :  { %v889_v27 = vpop.xlane.xlu2 %888 }
 0x7b3   :  { %v893_v28 = vmul.f32 %v889_v27, %v1405_v10  ;;  %v1056_v27 = vld [vmem:[%s1663_s11] sm:$0xff] }
 0x7b4   :  { %1090 = vmatpush.msra.mxu3 %v1056_v27 }
 0x7b5   :  { %v895_v29 = vadd.f32 1e-05, %v893_v28 }
 0x7b7   :  { %1219 = vrsqrt.f32 %v895_v29  ;;  %vm903_vm1 = vweird.f32 %v895_v29 }
 0x7ba   :  { %v892_v30 = vpop.xlane.xlu0 %891 }
 0x7bb   :  { %v894_v31 = vmul.f32 %v892_v30, %v1405_v10 }
 0x7bd   :  { %v1220_v32 = vpop.eup %1219  ;;  %v896_v33 = vadd.f32 1e-05, %v894_v31 }
 0x7be   :  { %v898_v34 = vmul.f32 %v1220_v32, %v895_v29  ;;  %vm904_vm15 = vweird.f32 %v1220_v32 }
 0x7bf   :  { %1221 = vrsqrt.f32 %v896_v33  ;;  %vm905_vm2 = vmor %vm903_vm1, %vm904_vm15  ;;  %vm913_vm4 = vweird.f32 %v896_v33 }
 0x7c0   :  { %v899_v35 = vmul.f32 %v1220_v32, %v898_v34 }
 0x7c2   :  { %v900_v36 = vmul.f32 0.5, %v899_v35 }
 0x7c4   :  { %v901_v37 = vsub.f32 1.5, %v900_v36 }
 0x7c5   :  { %v1222_v38 = vpop.eup %1221 }
 0x7c6   :  { %v902_v39 = vmul.f32 %v1220_v32, %v901_v37  ;;  %v908_v40 = vmul.f32 %v1222_v38, %v896_v33  ;;  %vm914_vm3 = vweird.f32 %v1222_v38 }
 0x7c7   :  { %vm915_vm5 = vmor %vm913_vm4, %vm914_vm3 }
 0x7c8   :  { %v906_v41 = vsel %vm905_vm2, %v1220_v32, %v902_v39  ;;  %v909_v58 = vmul.f32 %v1222_v38, %v908_v40 }
 0x7c9   :  { %v917_v10 = vmul.f32 %v906_v41, %v883_v13 }
 0x7ca   :  { %v910_v43 = vmul.f32 0.5, %v909_v58 }
 0x7cb   :  { %v923_v44 = vmul.f32 %v1177_v24, %v917_v10 }
 0x7cc   :  { %v911_v45 = vsub.f32 1.5, %v910_v43 }
 0x7cd   :  { %v929_v46 = vadd.f32 %v1178_v42, %v923_v44 }
 0x7ce   :  { %v912_v47 = vmul.f32 %v1222_v38, %v911_v45 }
 0x7cf   :  { %1148 = vmatmul.msk.f32.vlgmr.msrb.gmra.mxu0 %vm77_vm0, %v929_v46 }
 0x7d0   :  { %v916_v48 = vsel %vm915_vm5, %v1222_v38, %v912_v47 }
 0x7d1   :  { %v918_v50 = vmul.f32 %v916_v48, %v884_v19 }
 0x7d3   :  { %v924_v51 = vmul.f32 %v1177_v24, %v918_v50 }
 0x7d5   :  { %v930_v49 = vadd.f32 %v1178_v42, %v924_v51 }
 0x7d7   :  { %1149 = vmatmul.msk.f32.gmra.mxu0 %vm77_vm0, %v930_v49 }
 0x84c   :  { %v962_v52 = vpop.f32.mrf.mxu0 }
 0x84d   :  { %v1599_v53 = vadd.f32 %v1179_v16, %v962_v52 }
 0x84f   :  { %v1602_v17 = vmul.f32 0.70710677, %v1599_v53 }
 0x851   :  { %v972_v54 = vmul.f32 %v1602_v17, %v1602_v17 }
 0x853   :  { %v973_v56 = vmin.f32 %v972_v54, 16.0 }
 0x854   :  { %v965_v55 = vpop.f32.mrf.mxu0 }
 0x855   :  { %v974_v59 = vmul.f32 2.1237322e-06, %v973_v56  ;;  %v985_v60 = vmul.f32 3.8918573e-05, %v973_v56  ;;  %v1609_v61 = vadd.f32 %v1179_v16, %v965_v55 }
 0x857   :  { %v975_v63 = vadd.f32 0.00028619796, %v974_v59  ;;  %v986_v0 = vadd.f32 0.001143296, %v985_v60  ;;  %v1615_v1 = vmul.f32 0.70710677, %v1609_v61 }
 0x858   :  { %v969_v15 = vmul.f32 0.5, %v1609_v61 }
 0x859   :  { %v976_v3 = vmul.f32 %v975_v63, %v973_v56  ;;  %v987_v4 = vmul.f32 %v986_v0, %v973_v56  ;;  %v1012_v5 = vmul.f32 %v1615_v1, %v1615_v1 }
 0x85b   :  { %v988_v8 = vadd.f32 0.014752088, %v987_v4  ;;  %v977_v9 = vadd.f32 0.0036580483, %v976_v3  ;;  %v1013_v11 = vmin.f32 %v1012_v5, 16.0  ;;  %v968_v5 = vmul.f32 0.5, %v1599_v53 }
 0x85c   :  { %v1180_v53 = vld [vmem:[%s1664_s12] ss:$0 sm:$0xff] }
 0x85d   :  { %v989_v13 = vmul.f32 %v988_v8, %v973_v56  ;;  %v1014_v14 = vmul.f32 2.1237322e-06, %v1013_v11  ;;  %v1025_v6 = vmul.f32 3.8918573e-05, %v1013_v11  ;;  %v978_v19 = vmul.f32 %v977_v9, %v973_v56 }
 0x85f   :  { %v990_v18 = vadd.f32 0.112945676, %v989_v13  ;;  %v1015_v20 = vadd.f32 0.00028619796, %v1014_v14  ;;  %v1026_v21 = vadd.f32 0.001143296, %v1025_v6 }
 0x860   :  { %v979_v29 = vadd.f32 0.05243302, %v978_v19 }
 0x861   :  { %v991_v23 = vmul.f32 %v990_v18, %v973_v56  ;;  %v1016_v25 = vmul.f32 %v1015_v20, %v1013_v11  ;;  %v1027_v26 = vmul.f32 %v1026_v21, %v1013_v11 }
 0x862   :  { %v980_v35 = vmul.f32 %v979_v29, %v973_v56 }
 0x863   :  { %v992_v28 = vadd.f32 0.4994258, %v991_v23  ;;  %v1028_v30 = vadd.f32 0.014752088, %v1027_v26  ;;  %v1017_v32 = vadd.f32 0.0036580483, %v1016_v25 }
 0x864   :  { %v981_v39 = vadd.f32 0.18741608, %v980_v35 }
 0x865   :  { %v993_v31 = vmul.f32 %v992_v28, %v973_v56  ;;  %v1029_v33 = vmul.f32 %v1028_v30, %v1013_v11  ;;  %v1018_v37 = vmul.f32 %v1017_v32, %v1013_v11 }
 0x866   :  { %v982_v10 = vmul.f32 %v981_v39, %v973_v56 }
 0x867   :  { %v994_v34 = vadd.f32 1.0, %v993_v31  ;;  %v1030_v36 = vadd.f32 0.112945676, %v1029_v33  ;;  %v1019_v24 = vadd.f32 0.05243302, %v1018_v37 }
 0x868   :  { %v983_v47 = vadd.f32 1.1283791, %v982_v10 }
 0x869   :  { %1223 = vrcp.f32 %v994_v34  ;;  %v1031_v38 = vmul.f32 %v1030_v36, %v1013_v11  ;;  %v1020_v44 = vmul.f32 %v1019_v24, %v1013_v11  ;;  %v1006_v46 = vand.u32 2147483648, %v994_v34 }
 0x86a   :  { %v1004_v50 = vand.u32 2147483647, %v994_v34  ;;  %vm1000_vm7 = vweird.f32 %v994_v34  ;;  %v984_v54 = vmul.f32 %v983_v47, %v1602_v17 }
 0x86b   :  { %v1032_v40 = vadd.f32 0.4994258, %v1031_v38  ;;  %v1021_v51 = vadd.f32 0.18741608, %v1020_v44  ;;  %v1007_v16 = vor.u32 1.1754944e-38, %v1006_v46 }
 0x86c   :  { %vm1005_vm10 = vcmp.eq.f32.partialorder %v1004_v50, 8.507059e+37 }
 0x86d   :  { %v1033_v41 = vmul.f32 %v1032_v40, %v1013_v11  ;;  %v1022_v57 = vmul.f32 %v1021_v51, %v1013_v11 }
 0x86f   :  { %v1224_v58 = vpop.eup %1223  ;;  %v1034_v43 = vadd.f32 1.0, %v1033_v41  ;;  %v1023_v2 = vadd.f32 1.1283791, %v1022_v57 }
 0x870   :  { %v996_v42 = vmul.f32 %v1224_v58, %v994_v34  ;;  %vm1001_vm6 = vweird.f32 %v1224_v58 }
 0x871   :  { %1225 = vrcp.f32 %v1034_v43  ;;  %vm1002_vm9 = vmor %vm1000_vm7, %vm1001_vm6  ;;  %v1046_v0 = vand.u32 2147483648, %v1034_v43  ;;  %v1044_v4 = vand.u32 2147483647, %v1034_v43  ;;  %vm1040_vm12 = vweird.f32 %v1034_v43 }
 0x872   :  { %v997_v45 = vsub.f32 1.0, %v996_v42  ;;  %v1024_v11 = vmul.f32 %v1023_v2, %v1615_v1 }
 0x873   :  { %v1047_v9 = vor.u32 1.1754944e-38, %v1046_v0  ;;  %vm1045_vm14 = vcmp.eq.f32.partialorder %v1044_v4, 8.507059e+37 }
 0x874   :  { %v998_v48 = vmul.f32 %v1224_v58, %v997_v45 }
 0x876   :  { %v999_v49 = vadd.f32 %v1224_v58, %v998_v48 }
 0x877   :  { %v1226_v52 = vpop.eup %1225 }
 0x878   :  { %v1003_v55 = vsel %vm1002_vm9, %v1224_v58, %v999_v49  ;;  %v1036_v59 = vmul.f32 %v1226_v52, %v1034_v43  ;;  %vm1041_vm11 = vweird.f32 %v1226_v52 }
 0x879   :  { %v1008_v56 = vsel %vm1005_vm10, %v1007_v16, %v1003_v55  ;;  %vm1042_vm13 = vmor %vm1040_vm12, %vm1041_vm11 }
 0x87a   :  { %v1009_v60 = vmul.f32 %v1008_v56, %v984_v54  ;;  %v1037_v62 = vsub.f32 1.0, %v1036_v59 }
 0x87c   :  { %v1150_v63 = vclamps-f32 %v1009_v60, 1.0  ;;  %v1038_v3 = vmul.f32 %v1226_v52, %v1037_v62 }
 0x87e   :  { %v1052_v7 = vadd.f32 1.0, %v1150_v63  ;;  %v1039_v8 = vadd.f32 %v1226_v52, %v1038_v3 }
 0x880   :  { %v1054_v17 = vmul.f32 %v1052_v7, %v968_v5  ;;  %v1043_v12 = vsel %vm1042_vm13, %v1226_v52, %v1039_v8 }
 0x881   :  { %v1048_v13 = vsel %vm1045_vm14, %v1047_v9, %v1043_v12 }
 0x882   :  { %1152 = vmatmul.msk.f32.vlgmr.msra.gmra.mxu3 %vm1068_vm8, %v1054_v17  ;;  %v1049_v14 = vmul.f32 %v1048_v13, %v1024_v11 }
 0x884   :  { %v1151_v6 = vclamps-f32 %v1049_v14, 1.0 }
 0x886   :  { %v1053_v18 = vadd.f32 1.0, %v1151_v6 }
 0x888   :  { %v1055_v19 = vmul.f32 %v1053_v18, %v969_v15 }
 0x88a   :  { %1153 = vmatmul.msk.f32.gmra.mxu3 %vm1068_vm8, %v1055_v19 }
 0x905   :  { %v1092_v20 = vpop.f32.mrf.mxu3 }
 0x906   :  { %v1093_v21 = vadd.f32 %v1180_v53, %v1092_v20 }
 0x908   :  { %1098 = vst.msk [vmem:[#allocation8] sm:$0xff] %vm77_vm0, %v1093_v21 }
 0x90d   :  { %v1095_v1 = vpop.f32.mrf.mxu3 }
 0x90e   :  { %v1096_v22 = vadd.f32 %v1180_v53, %v1095_v1 }
 0x910   :  { %1099 = vst.msk [vmem:[#allocation8 + $0x8] sm:$0xff] %vm77_vm0, %v1096_v22 }
 0x911   :  { %1112 = dma.vmem_to_hbm [thread:$0]  %s1105_s19, 256, %s1107_s1, [#allocation5], %s1306_s16, %s1306_s16, %s1307_s17  }
 0x912   :  { %1303 = dma.done.wait [#allocation5], 256  }
 0x913   :  { %1304 = vsyncadd [#allocation5], 4294967040 }
 0x914   :  { %1117 = vsyncpa [#allocation4], 1 }
 0x915   :  { %1118 = vsyncpa [#allocation7], 1 }
 0x916   :  { %1119 = vsyncpa [#allocation5], 1 }

// kernel: tpu_custom_call.1
= control target key start
LH: loop header
LB: loop body
LE: loop exit
PB: predicated region body
PF: predicated region fallthrough
CT: control target
= control target key end

     0   :  { %18 = vsyncpa [#allocation4], 0  ;;  %s1652_s0 = inlined_call_operand.hbm [shape: f32[16,32], index: 0, kind: input, shape index: {}]   ;;  %s1653_s1 = inlined_call_operand.hbm [shape: f32[1,32], index: 1, kind: input, shape index: {}]   ;;  %s1654_s2 = inlined_call_operand.vmem [shape: f32[1,32], index: 2, kind: input, shape index: {}]   ;;  %s1655_s3 = inlined_call_operand.vmem [shape: f32[32,96], index: 3, kind: input, shape index: {}]   ;;  %s1656_s4 = inlined_call_operand.vmem [shape: f32[1,96], index: 4, kind: input, shape index: {}]   ;;  %s1657_s5 = inlined_call_operand.vmem [shape: f32[32,32], index: 5, kind: input, shape index: {}]   ;;  %s1658_s6 = inlined_call_operand.vmem [shape: f32[1,32], index: 6, kind: input, shape index: {}]   ;;  %s1659_s7 = inlined_call_operand.vmem [shape: f32[1,32], index: 7, kind: input, shape index: {}]   ;;  %s1660_s8 = inlined_call_operand.vmem [shape: f32[1,32], index: 8, kind: input, shape index: {}]   ;;  %s1661_s9 = inlined_call_operand.vmem [shape: f32[32,64], index: 9, kind: input, shape index: {}]   ;;  %s1662_s10 = inlined_call_operand.vmem [shape: f32[1,64], index: 10, kind: input, shape index: {}]   ;;  %s1663_s11 = inlined_call_operand.vmem [shape: f32[64,32], index: 11, kind: input, shape index: {}]   ;;  %s1664_s12 = inlined_call_operand.vmem [shape: f32[1,32], index: 12, kind: input, shape index: {}]   ;;  %s1665_s13 = inlined_call_operand.hbm [shape: f32[16,32], index: 13, kind: output, shape index: {}]  }
   0x1   :  { %19 = vsyncpa [#allocation7], 0 }
   0x2   :  { %20 = vsyncpa [#allocation5], 0  ;;  %s25_s27 = sshll.u32 %s1652_s0, 4  ;;  %s1305_s28 = smov [#allocation3]   ;;  %s26_s27 = int_to_ptr.hbm [resolvable:$true] %s25_s27 }
   0x3   :  { %s27_s29 = sshll.u32 %s1305_s28, 4  ;;  %s39_s15 = sshll.u32 %s1653_s1, 4  ;;  %s28_s29 = int_to_ptr.vmem [resolvable:$true] %s27_s29  ;;  %s40_s15 = int_to_ptr.hbm [resolvable:$true] %s39_s15 }
   0x4   :  { %s1306_s16 = smov 128   ;;  %s1307_s17 = smov 8  }
   0x5   :  { %33 = dma.hbm_to_vmem [thread:$0]  %s26_s27, 256, %s28_s29, [#allocation4], %s1306_s16, %s1306_s16, %s1307_s17  }
   0x6   :  { %s1308_s18 = smov [#allocation6]  }
   0x7   :  { %s41_s19 = sshll.u32 %s1308_s18, 4  ;;  %s42_s19 = int_to_ptr.vmem [resolvable:$true] %s41_s19 }
   0x8   :  { %44 = dma.hbm_to_vmem [thread:$0]  %s40_s15, 16, %s42_s19, [#allocation7]  }
   0x9   :  { %1299 = dma.done.wait [#allocation4], 256  }
   0xa   :  { %1300 = vsyncadd [#allocation4], 4294967040 }
   0xb   :  { %1301 = dma.done.wait [#allocation7], 16  }
   0xc   :  { %1302 = vsyncadd [#allocation7], 4294967280  ;;  %vm77_vm0 = vcmask 261120   ;;  %v75_v0 = vld [vmem:[#allocation3] sm:$0xff]  ;;  %v76_v1 = vld [vmem:[#allocation3 + $0x8] sm:$0xff]  ;;  %v1309_v4 = vmov 32.0  }
   0xd   :  { %v78_v2 = vsel %vm77_vm0, %v75_v0, 0.0  ;;  %v81_v3 = vsel %vm77_vm0, %v76_v1, 0.0  ;;  %1181 = vrcp.f32 %v1309_v4  ;;  %v144_v21 = vld [vmem:[%s1655_s3 + $0x18] sm:$0xff]  ;;  %v143_v22 = vld [vmem:[%s1655_s3 + $0x10] sm:$0xff]  ;;  %v142_v23 = vld [vmem:[%s1655_s3 + $0x8] sm:$0xff]  ;;  %s1310_s29 = smov 64  }
   0xe   :  { %79 = vadd.xlane.f32.xlu0 %v78_v2  ;;  %82 = vadd.xlane.f32.xlu1 %v81_v3  ;;  %v141_v24 = vld [vmem:[%s1655_s3] sm:$0xff]  ;;  %s1312_s30 = smov 80   ;;  %s1313_s14 = smov 88   ;;  %vm181_vm8 = vcmask 64512  }
   0xf   :  { %167 = vmatpush.msra.mxu0 %v144_v21  ;;  %v1173_v43 = vld [vmem:[#allocation6] ss:$0 sm:$0xff]  ;;  %s1315_s15 = smov 104   ;;  %s1316_s18 = smov 120  }
  0x10   :  { %v1174_v47 = vld [vmem:[%s1654_s2] ss:$0 sm:$0xff]  ;;  %s1311_s2 = smov 96   ;;  %s1317_s19 = smov 72  }
  0x11   :  { %168 = vmatpush.msra.mxu0 %v143_v22  ;;  %v1175_v53 = vld [vmem:[%s1656_s4] ss:$0 sm:$0xff]  ;;  %s1314_s4 = smov 112   ;;  %s1318_s0 = smov 56  }
  0x12   :  { %s1319_s1 = smov 48   ;;  %s1320_s20 = smov 40  }
  0x13   :  { %v1182_v5 = vpop.eup %1181  ;;  %169 = vmatpush.msra.mxu0 %v142_v23  ;;  %s1321_s21 = smov 16   ;;  %s1322_s22 = smov 24  }
  0x14   :  { %v85_v6 = vmul.f32 32.0, %v1182_v5  ;;  %vm89_vm1 = vweird.f32 %v1182_v5 }
  0x15   :  { %170 = vmatpush.msra.mxu0 %v141_v24 }
  0x16   :  { %v86_v7 = vsub.f32 1.0, %v85_v6 }
  0x18   :  { %v87_v8 = vmul.f32 %v1182_v5, %v86_v7 }
  0x1a   :  { %v88_v9 = vadd.f32 %v1182_v5, %v87_v8 }
  0x1c   :  { %v1405_v10 = vsel %vm89_vm1, %v1182_v5, %v88_v9 }
  0x81   :  { %v80_v11 = vpop.xlane.xlu0 %79  ;;  %v83_v12 = vpop.xlane.xlu1 %82 }
  0x82   :  { %v91_v13 = vmul.f32 %v1405_v10, %v80_v11  ;;  %v92_v14 = vmul.f32 %v1405_v10, %v83_v12 }
  0x84   :  { %v93_v15 = vsub.f32 %v75_v0, %v91_v13  ;;  %v94_v16 = vsub.f32 %v76_v1, %v92_v14 }
  0x86   :  { %v95_v17 = vmul.f32 %v93_v15, %v93_v15  ;;  %v96_v18 = vmul.f32 %v94_v16, %v94_v16 }
  0x88   :  { %v97_v19 = vsel %vm77_vm0, %v95_v17, 0.0  ;;  %v100_v20 = vsel %vm77_vm0, %v96_v18, 0.0 }
  0x89   :  { %98 = vadd.xlane.f32.xlu0 %v97_v19  ;;  %101 = vadd.xlane.f32.xlu2 %v100_v20 }
  0xfc   :  { %v99_v25 = vpop.xlane.xlu0 %98  ;;  %v102_v26 = vpop.xlane.xlu2 %101 }
  0xfd   :  { %v103_v27 = vmul.f32 %v99_v25, %v1405_v10  ;;  %v104_v28 = vmul.f32 %v102_v26, %v1405_v10 }
  0xff   :  { %v105_v29 = vadd.f32 1e-05, %v103_v27  ;;  %v106_v30 = vadd.f32 1e-05, %v104_v28 }
 0x101   :  { %1183 = vrsqrt.f32 %v105_v29  ;;  %vm123_vm2 = vweird.f32 %v106_v30  ;;  %vm113_vm5 = vweird.f32 %v105_v29 }
 0x102   :  { %1185 = vrsqrt.f32 %v106_v30 }
 0x107   :  { %v1184_v31 = vpop.eup %1183 }
 0x108   :  { %v1186_v32 = vpop.eup %1185  ;;  %v108_v33 = vmul.f32 %v1184_v31, %v105_v29  ;;  %vm114_vm4 = vweird.f32 %v1184_v31 }
 0x109   :  { %v118_v34 = vmul.f32 %v1186_v32, %v106_v30  ;;  %vm124_vm3 = vweird.f32 %v1186_v32  ;;  %vm115_vm7 = vmor %vm113_vm5, %vm114_vm4 }
 0x10a   :  { %v109_v35 = vmul.f32 %v1184_v31, %v108_v33  ;;  %vm125_vm6 = vmor %vm123_vm2, %vm124_vm3 }
 0x10b   :  { %v119_v36 = vmul.f32 %v1186_v32, %v118_v34 }
 0x10c   :  { %v110_v37 = vmul.f32 0.5, %v109_v35 }
 0x10d   :  { %v120_v38 = vmul.f32 0.5, %v119_v36 }
 0x10e   :  { %v111_v39 = vsub.f32 1.5, %v110_v37 }
 0x10f   :  { %v121_v40 = vsub.f32 1.5, %v120_v38 }
 0x110   :  { %v112_v41 = vmul.f32 %v1184_v31, %v111_v39 }
 0x111   :  { %v122_v42 = vmul.f32 %v1186_v32, %v121_v40 }
 0x112   :  { %v116_v44 = vsel %vm115_vm7, %v1184_v31, %v112_v41 }
 0x113   :  { %v126_v45 = vsel %vm125_vm6, %v1186_v32, %v122_v42  ;;  %v127_v46 = vmul.f32 %v116_v44, %v93_v15 }
 0x114   :  { %v128_v49 = vmul.f32 %v126_v45, %v94_v16 }
 0x115   :  { %v133_v48 = vmul.f32 %v1173_v43, %v127_v46 }
 0x116   :  { %v134_v51 = vmul.f32 %v1173_v43, %v128_v49 }
 0x117   :  { %v139_v50 = vadd.f32 %v1174_v47, %v133_v48 }
 0x118   :  { %v140_v52 = vadd.f32 %v1174_v47, %v134_v51 }
 0x119   :  { %1120 = vmatmul.msk.f32.vlgmr.msra.gmra.mxu0 %vm77_vm0, %v139_v50 }
 0x121   :  { %1121 = vmatmul.msk.f32.gmra.mxu0 %vm77_vm0, %v140_v52 }
 0x196   :  { %v172_v54 = vpop.f32.mrf.mxu0 }
 0x197   :  { %v1433_v55 = vadd.f32 %v1175_v53, %v172_v54 }
 0x199   :  { %281 = vrot.lane.b32.xlu0 %v1433_v55, %s1310_s29  ;;  %179 = vrot.lane.b32.xlu1 %v1433_v55, %s1311_s2 }
 0x19e   :  { %v175_v56 = vpop.f32.mrf.mxu0 }
 0x19f   :  { %v1438_v57 = vadd.f32 %v1175_v53, %v175_v56 }
 0x1a1   :  { %504 = vrot.lane.b32.xlu0 %v1433_v55, %s1312_s30  ;;  %365 = vrot.lane.b32.xlu1 %v1438_v57, %s1313_s14 }
 0x1a9   :  { %337 = vrot.lane.b32.xlu1 %v1433_v55, %s1313_s14 }
 0x1b1   :  { %502 = vrot.lane.b32.xlu1 %v1433_v55, %s1314_s4 }
 0x1b9   :  { %532 = vrot.lane.b32.xlu1 %v1438_v57, %s1312_s30 }
 0x1c1   :  { %697 = vrot.lane.b32.xlu1 %v1438_v57, %s1315_s15 }
 0x20b   :  { %v282_v58 = vpop.permute.xlu0 %281  ;;  %v180_v59 = vpop.permute.xlu1 %179 }
 0x20c   :  { %1122 = vmatpush.xpose.msk.msra.mxu1 %vm181_vm8, %v180_v59 }
 0x20f   :  { %1123 = vmatmul.msk.f32.vlgmr.msra.gmra.mxu1 %vm181_vm8, %v1433_v55 }
 0x210   :  { %302 = vmatpush.msrb.mxu1 %v282_v58 }
 0x213   :  { %v366_v60 = vpop.permute.xlu1 %365  ;;  %v505_v7 = vpop.permute.xlu0 %504 }
 0x21b   :  { %v338_v61 = vpop.permute.xlu1 %337 }
 0x21c   :  { %1128 = vmatpush.xpose.msk.msra.mxu1 %vm181_vm8, %v338_v61 }
 0x223   :  { %v503_v0 = vpop.permute.xlu1 %502 }
 0x22b   :  { %v533_v1 = vpop.permute.xlu1 %532 }
 0x22c   :  { %1136 = vmatpush.xpose.msk.msrb.mxu0 %vm181_vm8, %v533_v1 }
 0x233   :  { %v698_v34 = vpop.permute.xlu1 %697 }
 0x28c   :  { %v203_v62 = vpop.f32.mrf.mxu1 }
 0x28d   :  { %v233_v63 = vsel %vm181_vm8, %v203_v62, -inf }
 0x28e   :  { %234 = vmax.xlane.f32.xlu2 %v233_v63 }
 0x2a6   :  { %207 = vrot.lane.b32.xlu2 %v1438_v57, %s1311_s2 }
 0x2ae   :  { %363 = vrot.lane.b32.xlu2 %v1438_v57, %s1316_s18 }
 0x2b6   :  { %335 = vrot.lane.b32.xlu2 %v1433_v55, %s1316_s18  ;;  %s1323_s18 = smov [#allocation8]  }
 0x2be   :  { %669 = vrot.lane.b32.xlu2 %v1433_v55, %s1315_s15 }
 0x2c6   :  { %699 = vrot.lane.b32.xlu2 %v1438_v57, %s1317_s19 }
 0x301   :  { %v235_v2 = vpop.xlane.xlu2 %234 }
 0x302   :  { %v239_v3 = vsub.f32 %v203_v62, %v235_v2 }
 0x304   :  { %v241_v4 = vmul.f32 1.442695, %v239_v3 }
 0x306   :  { %1187 = vpow2.f32 %v241_v4 }
 0x309   :  { %v208_v5 = vpop.permute.xlu2 %207 }
 0x30a   :  { %1124 = vmatpush.xpose.msk.msra.mxu2 %vm181_vm8, %v208_v5 }
 0x30c   :  { %v1188_v6 = vpop.eup %1187 }
 0x30d   :  { %1125 = vmatmul.msk.f32.vlgmr.msra.gmra.mxu2 %vm181_vm8, %v1438_v57  ;;  %v245_v8 = vsel %vm181_vm8, %v1188_v6, 0.0 }
 0x30e   :  { %1130 = vmatpush.xpose.msk.msrb.mxu2 %vm181_vm8, %v366_v60  ;;  %246 = vadd.xlane.f32.xlu0 %v245_v8 }
 0x311   :  { %v364_v9 = vpop.permute.xlu2 %363 }
 0x312   :  { %1134 = vmatpush.xpose.msk.msra.mxu2 %vm181_vm8, %v505_v7 }
 0x315   :  { %1131 = vmatmul.msk.f32.vlgmr.msrb.gmra.mxu2 %vm181_vm8, %v364_v9 }
 0x319   :  { %v336_v11 = vpop.permute.xlu2 %335 }
 0x31d   :  { %1135 = vmatmul.msk.f32.vlgmr.msra.gmra.mxu2 %vm181_vm8, %v503_v0 }
 0x321   :  { %v670_v12 = vpop.permute.xlu2 %669 }
 0x322   :  { %671 = vrot.lane.b32.xlu0 %v1433_v55, %s1317_s19  ;;  %s1104_s19 = sshll.u32 %s1323_s18, 4  ;;  %s1105_s19 = int_to_ptr.vmem [resolvable:$true] %s1104_s19 }
 0x329   :  { %v700_v13 = vpop.permute.xlu2 %699 }
 0x32a   :  { %530 = vrot.lane.b32.xlu0 %v1438_v57, %s1314_s4  ;;  %1142 = vmatpush.xpose.msk.msra.mxu0 %vm181_vm8, %v700_v13 }
 0x381   :  { %v247_v14 = vpop.xlane.xlu0 %246 }
 0x382   :  { %1189 = vrcp.f32 %v247_v14  ;;  %v262_v18 = vand.u32 2147483648, %v247_v14  ;;  %v260_v20 = vand.u32 2147483647, %v247_v14  ;;  %vm256_vm10 = vweird.f32 %v247_v14 }
 0x384   :  { %v263_v22 = vor.u32 1.1754944e-38, %v262_v18  ;;  %vm261_vm12 = vcmp.eq.f32.partialorder %v260_v20, 8.507059e+37 }
 0x388   :  { %v1190_v15 = vpop.eup %1189 }
 0x389   :  { %v252_v16 = vmul.f32 %v1190_v15, %v247_v14  ;;  %vm257_vm9 = vweird.f32 %v1190_v15 }
 0x38a   :  { %vm258_vm11 = vmor %vm256_vm10, %vm257_vm9 }
 0x38b   :  { %v253_v17 = vsub.f32 1.0, %v252_v16 }
 0x38d   :  { %v254_v19 = vmul.f32 %v1190_v15, %v253_v17 }
 0x38f   :  { %v255_v21 = vadd.f32 %v1190_v15, %v254_v19 }
 0x390   :  { %v230_v23 = vpop.f32.mrf.mxu2 }
 0x391   :  { %v236_v24 = vsel %vm181_vm8, %v230_v23, -inf  ;;  %v259_v25 = vsel %vm258_vm11, %v1190_v15, %v255_v21 }
 0x392   :  { %237 = vmax.xlane.f32.xlu0 %v236_v24  ;;  %v264_v26 = vsel %vm261_vm12, %v263_v22, %v259_v25 }
 0x393   :  { %v279_v27 = vmul.f32 %v1188_v6, %v264_v26 }
 0x394   :  { %v672_v28 = vpop.permute.xlu0 %671 }
 0x395   :  { %1126 = vmatmul.msk.f32.vlgmr.msrb.gmra.mxu1 %vm181_vm8, %v279_v27  ;;  %1140 = vmatpush.xpose.msk.msrb.mxu2 %vm181_vm8, %v672_v28 }
 0x398   :  { %v388_v29 = vpop.f32.mrf.mxu2  ;;  %1141 = vmatmul.msk.f32.vlgmr.msrb.gmra.mxu2 %vm181_vm8, %v670_v12 }
 0x399   :  { %v394_v30 = vsel %vm181_vm8, %v388_v29, -inf }
 0x39a   :  { %395 = vmax.xlane.f32.xlu0 %v394_v30 }
 0x39c   :  { %v531_v31 = vpop.permute.xlu0 %530 }
 0x39d   :  { %1129 = vmatmul.msk.f32.vlgmr.msra.gmra.mxu1 %vm181_vm8, %v336_v11  ;;  %1137 = vmatmul.msk.f32.vlgmr.msrb.gmra.mxu0 %vm181_vm8, %v531_v31 }
 0x3a0   :  { %v527_v32 = vpop.f32.mrf.mxu2 }
 0x3a1   :  { %v558_v33 = vsel %vm181_vm8, %v527_v32, -inf }
 0x3a2   :  { %559 = vmax.xlane.f32.xlu1 %v558_v33 }
 0x3a5   :  { %1143 = vmatmul.msk.f32.vlgmr.msra.gmra.mxu0 %vm181_vm8, %v698_v34 }
 0x405   :  { %v238_v35 = vpop.xlane.xlu0 %237 }
 0x406   :  { %v240_v41 = vsub.f32 %v230_v23, %v238_v35 }
 0x408   :  { %v243_v47 = vmul.f32 1.442695, %v240_v41 }
 0x40d   :  { %v396_v36 = vpop.xlane.xlu0 %395 }
 0x40e   :  { %v398_v37 = vsub.f32 %v388_v29, %v396_v36 }
 0x410   :  { %v401_v39 = vmul.f32 1.442695, %v398_v37 }
 0x412   :  { %v304_v38 = vpop.f32.mrf.mxu1  ;;  %1191 = vpow2.f32 %v401_v39 }
 0x413   :  { %333 = vst.msk [vmem:[#allocation2] sm:$0xff] %vm181_vm8, %v304_v38  ;;  %1193 = vpow2.f32 %v243_v47 }
 0x415   :  { %v560_v40 = vpop.xlane.xlu1 %559 }
 0x416   :  { %v564_v44 = vsub.f32 %v527_v32, %v560_v40 }
 0x418   :  { %v566_v48 = vmul.f32 1.442695, %v564_v44  ;;  %v1482_v49 = vpop.eup %1191 }
 0x419   :  { %v406_v53 = vsel %vm181_vm8, %v1482_v49, 0.0  ;;  %v1488_v56 = vpop.eup %1193 }
 0x41a   :  { %v360_v42 = vpop.f32.mrf.mxu1  ;;  %v555_v43 = vpop.f32.mrf.mxu0  ;;  %1195 = vpow2.f32 %v566_v48  ;;  %v248_v59 = vsel %vm181_vm8, %v1488_v56, 0.0 }
 0x41b   :  { %v391_v45 = vsel %vm181_vm8, %v360_v42, -inf  ;;  %v561_v46 = vsel %vm181_vm8, %v555_v43, -inf  ;;  %v694_v50 = vpop.f32.mrf.mxu2 }
 0x41c   :  { %392 = vmax.xlane.f32.xlu2 %v391_v45  ;;  %562 = vmax.xlane.f32.xlu1 %v561_v46  ;;  %v725_v52 = vsel %vm181_vm8, %v694_v50, -inf }
 0x420   :  { %v1490_v58 = vpop.eup %1195 }
 0x421   :  { %v570_v60 = vsel %vm181_vm8, %v1490_v58, 0.0 }
 0x422   :  { %v722_v51 = vpop.f32.mrf.mxu0 }
 0x423   :  { %v728_v54 = vsel %vm181_vm8, %v722_v51, -inf }
 0x424   :  { %726 = vmax.xlane.f32.xlu2 %v725_v52  ;;  %407 = vadd.xlane.f32.xlu1 %v406_v53 }
 0x425   :  { %729 = vmax.xlane.f32.xlu0 %v728_v54 }
 0x42c   :  { %249 = vadd.xlane.f32.xlu2 %v248_v59 }
 0x42d   :  { %571 = vadd.xlane.f32.xlu0 %v570_v60 }
 0x43d   :  { %439 = vrot.lane.b32.xlu1 %v1433_v55, %s1318_s0 }
 0x444   :  { %307 = vrot.lane.b32.xlu2 %v1438_v57, %s1310_s29 }
 0x445   :  { %465 = vrot.lane.b32.xlu1 %v1438_v57, %s1318_s0 }
 0x48f   :  { %v393_v61 = vpop.xlane.xlu2 %392  ;;  %v563_v62 = vpop.xlane.xlu1 %562 }
 0x490   :  { %v397_v63 = vsub.f32 %v360_v42, %v393_v61  ;;  %v565_v7 = vsub.f32 %v555_v43, %v563_v62 }
 0x492   :  { %v399_v0 = vmul.f32 1.442695, %v397_v63  ;;  %v568_v13 = vmul.f32 1.442695, %v565_v7 }
 0x494   :  { %1197 = vpow2.f32 %v399_v0 }
 0x497   :  { %v727_v1 = vpop.xlane.xlu2 %726  ;;  %v408_v2 = vpop.xlane.xlu1 %407 }
 0x498   :  { %v731_v3 = vsub.f32 %v694_v50, %v727_v1  ;;  %v730_v4 = vpop.xlane.xlu0 %729  ;;  %1199 = vrcp.f32 %v408_v2  ;;  %v434_v33 = vand.u32 2147483648, %v408_v2  ;;  %vm428_vm2 = vweird.f32 %v408_v2 }
 0x499   :  { %v732_v5 = vsub.f32 %v722_v51, %v730_v4  ;;  %v432_v35 = vand.u32 2147483647, %v408_v2 }
 0x49a   :  { %v1500_v6 = vpop.eup %1197  ;;  %v733_v8 = vmul.f32 1.442695, %v731_v3  ;;  %v435_v41 = vor.u32 1.1754944e-38, %v434_v33 }
 0x49b   :  { %v735_v9 = vmul.f32 1.442695, %v732_v5  ;;  %v403_v11 = vsel %vm181_vm8, %v1500_v6, 0.0  ;;  %vm433_vm5 = vcmp.eq.f32.partialorder %v432_v35, 8.507059e+37 }
 0x49c   :  { %1201 = vpow2.f32 %v733_v8  ;;  %404 = vadd.xlane.f32.xlu1 %v403_v11 }
 0x49d   :  { %1203 = vpow2.f32 %v735_v9 }
 0x49e   :  { %v1200_v12 = vpop.eup %1199 }
 0x49f   :  { %v250_v14 = vpop.xlane.xlu2 %249  ;;  %v424_v15 = vmul.f32 %v1200_v12, %v408_v2  ;;  %vm429_vm14 = vweird.f32 %v1200_v12 }
 0x4a0   :  { %1205 = vrcp.f32 %v250_v14  ;;  %v276_v27 = vand.u32 2147483648, %v250_v14  ;;  %v274_v30 = vand.u32 2147483647, %v250_v14  ;;  %vm270_vm15 = vweird.f32 %v250_v14  ;;  %vm430_vm4 = vmor %vm428_vm2, %vm429_vm14  ;;  %v572_v45 = vpop.xlane.xlu0 %571 }
 0x4a1   :  { %1207 = vpow2.f32 %v568_v13  ;;  %v425_v20 = vsub.f32 1.0, %v424_v15  ;;  %vm581_vm12 = vweird.f32 %v572_v45 }
 0x4a2   :  { %v1504_v16 = vpop.eup %1201  ;;  %v277_v34 = vor.u32 1.1754944e-38, %v276_v27  ;;  %vm275_vm3 = vcmp.eq.f32.partialorder %v274_v30, 8.507059e+37 }
 0x4a3   :  { %v1506_v17 = vpop.eup %1203  ;;  %v737_v18 = vsel %vm181_vm8, %v1504_v16, 0.0  ;;  %v426_v25 = vmul.f32 %v1200_v12, %v425_v20 }
 0x4a4   :  { %v740_v19 = vsel %vm181_vm8, %v1506_v17, 0.0  ;;  %738 = vadd.xlane.f32.xlu0 %v737_v18 }
 0x4a5   :  { %741 = vadd.xlane.f32.xlu2 %v740_v19  ;;  %v427_v31 = vadd.f32 %v1200_v12, %v426_v25 }
 0x4a6   :  { %v1206_v21 = vpop.eup %1205 }
 0x4a7   :  { %v266_v22 = vmul.f32 %v1206_v21, %v250_v14  ;;  %v308_v23 = vpop.permute.xlu2 %307  ;;  %v1512_v24 = vpop.eup %1207  ;;  %vm271_vm13 = vweird.f32 %v1206_v21  ;;  %v431_v39 = vsel %vm430_vm4, %v1200_v12, %v427_v31  ;;  %v587_v12 = vand.u32 2147483648, %v572_v45 }
 0x4a8   :  { %328 = vmatpush.msra.mxu3 %v308_v23  ;;  %v573_v29 = vsel %vm181_vm8, %v1512_v24, 0.0  ;;  %vm272_vm1 = vmor %vm270_vm15, %vm271_vm13  ;;  %v436_v42 = vsel %vm433_vm5, %v435_v41, %v431_v39  ;;  %v585_v14 = vand.u32 2147483647, %v572_v45 }
 0x4a9   :  { %v267_v26 = vsub.f32 1.0, %v266_v22  ;;  %v438_v44 = vmul.f32 %v1482_v49, %v436_v42  ;;  %v588_v22 = vor.u32 1.1754944e-38, %v587_v12 }
 0x4ab   :  { %v268_v28 = vmul.f32 %v1206_v21, %v267_v26 }
 0x4ac   :  { %574 = vadd.xlane.f32.xlu0 %v573_v29 }
 0x4ad   :  { %v269_v32 = vadd.f32 %v1206_v21, %v268_v28 }
 0x4af   :  { %v440_v36 = vpop.permute.xlu1 %439  ;;  %v273_v37 = vsel %vm272_vm1, %v1206_v21, %v269_v32  ;;  %vm586_vm1 = vcmp.eq.f32.partialorder %v585_v14, 8.507059e+37 }
 0x4b0   :  { %460 = vmatpush.msrb.mxu3 %v440_v36  ;;  %v278_v38 = vsel %vm275_vm3, %v277_v34, %v273_v37 }
 0x4b1   :  { %v280_v40 = vmul.f32 %v1488_v56, %v278_v38 }
 0x4b3   :  { %1127 = vmatmul.msk.f32.vlgmr.msra.gmra.mxu3 %vm181_vm8, %v280_v40 }
 0x4b5   :  { %632 = vrot.lane.b32.xlu1 %v1438_v57, %s1319_s1 }
 0x4b7   :  { %v466_v43 = vpop.permute.xlu1 %465 }
 0x4b8   :  { %486 = vmatpush.msrb.mxu1 %v466_v43 }
 0x4b9   :  { %1133 = vmatmul.msk.f32.vlgmr.msrb.gmra.mxu1 %vm181_vm8, %v438_v44 }
 0x4c0   :  { %606 = vrot.lane.b32.xlu0 %v1433_v55, %s1319_s1  ;;  %s1106_s1 = sshll.u32 %s1665_s13, 4  ;;  %s1107_s1 = int_to_ptr.hbm [resolvable:$true] %s1106_s1 }
 0x4c8   :  { %773 = vrot.lane.b32.xlu0 %v1433_v55, %s1320_s20 }
 0x4d0   :  { %799 = vrot.lane.b32.xlu0 %v1438_v57, %s1320_s20 }
 0x50f   :  { %v405_v46 = vpop.xlane.xlu1 %404 }
 0x510   :  { %1209 = vrcp.f32 %v405_v46  ;;  %v420_v53 = vand.u32 2147483648, %v405_v46  ;;  %v418_v56 = vand.u32 2147483647, %v405_v46  ;;  %vm414_vm7 = vweird.f32 %v405_v46 }
 0x511   :  { %1211 = vrcp.f32 %v572_v45 }
 0x512   :  { %v421_v57 = vor.u32 1.1754944e-38, %v420_v53  ;;  %vm419_vm10 = vcmp.eq.f32.partialorder %v418_v56, 8.507059e+37  ;;  %v839_v56 = vld [vmem:[%s1657_s5 + $0x8] sm:$0xff] }
 0x516   :  { %v1210_v47 = vpop.eup %1209 }
 0x517   :  { %v410_v48 = vmul.f32 %v1210_v47, %v405_v46  ;;  %v1524_v50 = vpop.xlane.xlu0 %738  ;;  %v1212_v51 = vpop.eup %1211  ;;  %vm415_vm6 = vweird.f32 %v1210_v47 }
 0x518   :  { %1213 = vrcp.f32 %v1524_v50  ;;  %v577_v54 = vmul.f32 %v1212_v51, %v572_v45  ;;  %vm416_vm9 = vmor %vm414_vm7, %vm415_vm6  ;;  %v1527_v62 = vpop.xlane.xlu2 %741  ;;  %vm582_vm11 = vweird.f32 %v1212_v51  ;;  %v754_v31 = vand.u32 2147483648, %v1524_v50 }
 0x519   :  { %v411_v49 = vsub.f32 1.0, %v410_v48  ;;  %vm583_vm13 = vmor %vm581_vm12, %vm582_vm11  ;;  %vm748_vm5 = vweird.f32 %v1524_v50  ;;  %v752_v33 = vand.u32 2147483647, %v1524_v50  ;;  %v768_v41 = vand.u32 2147483648, %v1527_v62 }
 0x51a   :  { %v578_v61 = vsub.f32 1.0, %v577_v54  ;;  %v755_v38 = vor.u32 1.1754944e-38, %v754_v31  ;;  %v840_v54 = vld [vmem:[%s1657_s5 + $0x10] sm:$0xff] }
 0x51b   :  { %v412_v52 = vmul.f32 %v1210_v47, %v411_v49  ;;  %vm753_vm7 = vcmp.eq.f32.partialorder %v752_v33, 8.507059e+37  ;;  %v769_v45 = vor.u32 1.1754944e-38, %v768_v41 }
 0x51c   :  { %v579_v2 = vmul.f32 %v1212_v51, %v578_v61 }
 0x51d   :  { %v413_v55 = vadd.f32 %v1210_v47, %v412_v52 }
 0x51e   :  { %v1214_v63 = vpop.eup %1213  ;;  %v580_v8 = vadd.f32 %v1212_v51, %v579_v2  ;;  %v1176_v2 = vld [vmem:[%s1658_s6] ss:$0 sm:$0xff] }
 0x51f   :  { %v575_v59 = vpop.xlane.xlu0 %574  ;;  %v417_v60 = vsel %vm416_vm9, %v1210_v47, %v413_v55  ;;  %v744_v3 = vmul.f32 %v1214_v63, %v1524_v50  ;;  %vm749_vm4 = vweird.f32 %v1214_v63  ;;  %v838_v55 = vld [vmem:[%s1657_s5] sm:$0xff] }
 0x520   :  { %1215 = vrcp.f32 %v575_v59  ;;  %v422_v0 = vsel %vm419_vm10, %v421_v57, %v417_v60  ;;  %v599_v18 = vand.u32 2147483647, %v575_v59  ;;  %v584_v19 = vsel %vm583_vm13, %v1212_v51, %v580_v8  ;;  %vm750_vm6 = vmor %vm748_vm5, %vm749_vm4 }
 0x521   :  { %v437_v1 = vmul.f32 %v1500_v6, %v422_v0  ;;  %1217 = vrcp.f32 %v1527_v62  ;;  %v745_v9 = vsub.f32 1.0, %v744_v3  ;;  %v601_v6 = vand.u32 2147483648, %v575_v59 }
 0x522   :  { %vm595_vm15 = vweird.f32 %v575_v59  ;;  %v589_v26 = vsel %vm586_vm1, %v588_v22, %v584_v19  ;;  %vm600_vm3 = vcmp.eq.f32.partialorder %v599_v18, 8.507059e+37  ;;  %vm762_vm10 = vweird.f32 %v1527_v62  ;;  %v934_v22 = vld [vmem:[%s1661_s9 + $0x18] sm:$0xff] }
 0x523   :  { %1132 = vmatmul.msk.f32.vlgmr.msrb.gmra.mxu3 %vm181_vm8, %v437_v1  ;;  %v746_v21 = vmul.f32 %v1214_v63, %v745_v9  ;;  %v602_v25 = vor.u32 1.1754944e-38, %v601_v6  ;;  %v604_v35 = vmul.f32 %v1490_v58, %v589_v26  ;;  %v766_v58 = vand.u32 2147483647, %v1527_v62  ;;  %957 = vmatpush.msrb.mxu0 %v934_v22  ;;  %v931_v26 = vld [vmem:[%s1661_s9] sm:$0xff]  ;;  %v1057_v22 = vld [vmem:[%s1663_s11 + $0x8] sm:$0xff] }
 0x524   :  { %vm666_vm13 = vcmask 195712  }
 0x525   :  { %v747_v29 = vadd.f32 %v1214_v63, %v746_v21  ;;  %vm767_vm12 = vcmp.eq.f32.partialorder %v766_v58, 8.507059e+37 }
 0x526   :  { %v1216_v4 = vpop.eup %1215 }
 0x527   :  { %v591_v5 = vmul.f32 %v1216_v4, %v575_v59  ;;  %v633_v7 = vpop.permute.xlu1 %632  ;;  %v1218_v11 = vpop.eup %1217  ;;  %vm596_vm14 = vweird.f32 %v1216_v4  ;;  %v751_v37 = vsel %vm750_vm6, %v1214_v63, %v747_v29 }
 0x528   :  { %653 = vmatpush.msra.mxu1 %v633_v7  ;;  %v758_v20 = vmul.f32 %v1218_v11, %v1527_v62  ;;  %vm597_vm2 = vmor %vm595_vm15, %vm596_vm14  ;;  %v756_v40 = vsel %vm753_vm7, %v755_v38, %v751_v37  ;;  %vm763_vm9 = vweird.f32 %v1218_v11  ;;  %vm833_vm14 = vcmask 261312  }
 0x529   :  { %v592_v13 = vsub.f32 1.0, %v591_v5  ;;  %v771_v43 = vmul.f32 %v1504_v16, %v756_v40  ;;  %vm764_vm11 = vmor %vm762_vm10, %vm763_vm9 }
 0x52a   :  { %v759_v28 = vsub.f32 1.0, %v758_v20 }
 0x52b   :  { %v593_v15 = vmul.f32 %v1216_v4, %v592_v13 }
 0x52c   :  { %v760_v36 = vmul.f32 %v1218_v11, %v759_v28 }
 0x52d   :  { %v594_v23 = vadd.f32 %v1216_v4, %v593_v15 }
 0x52f   :  { %v598_v27 = vsel %vm597_vm2, %v1216_v4, %v594_v23  ;;  %v933_v23 = vld [vmem:[%s1661_s9 + $0x10] sm:$0xff] }
 0x530   :  { %v603_v30 = vsel %vm600_vm3, %v602_v25, %v598_v27  ;;  %958 = vmatpush.msrb.mxu0 %v933_v23  ;;  %v932_v25 = vld [vmem:[%s1661_s9 + $0x8] sm:$0xff] }
 0x531   :  { %v605_v32 = vmul.f32 %v1512_v24, %v603_v30  ;;  %v761_v24 = vadd.f32 %v1218_v11, %v760_v36 }
 0x532   :  { %v607_v34 = vpop.permute.xlu0 %606  ;;  %959 = vmatpush.msrb.mxu0 %v932_v25 }
 0x533   :  { %627 = vmatpush.msra.mxu3 %v607_v34  ;;  %1139 = vmatmul.msk.f32.vlgmr.msra.gmra.mxu1 %vm181_vm8, %v605_v32  ;;  %v765_v44 = vsel %vm764_vm11, %v1218_v11, %v761_v24  ;;  %v1177_v24 = vld [vmem:[%s1659_s7] ss:$0 sm:$0xff] }
 0x534   :  { %1138 = vmatmul.msk.f32.vlgmr.msra.gmra.mxu3 %vm181_vm8, %v604_v35  ;;  %v770_v46 = vsel %vm767_vm12, %v769_v45, %v765_v44  ;;  %960 = vmatpush.msrb.mxu0 %v931_v26 }
 0x535   :  { %v772_v48 = vmul.f32 %v1506_v17, %v770_v46  ;;  %v841_v17 = vld [vmem:[%s1657_s5 + $0x18] sm:$0xff] }
 0x536   :  { %v330_v39 = vpop.f32.mrf.mxu3  ;;  %v488_v51 = vpop.f32.mrf.mxu1  ;;  %864 = vmatpush.msra.mxu2 %v841_v17 }
 0x537   :  { %334 = vst.msk [vmem:[#allocation2 + $0x8] sm:$0xff] %vm181_vm8, %v330_v39 }
 0x538   :  { %865 = vmatpush.msra.mxu2 %v840_v54 }
 0x53a   :  { %v774_v42 = vpop.permute.xlu0 %773  ;;  %866 = vmatpush.msra.mxu2 %v839_v56 }
 0x53b   :  { %794 = vmatpush.msrb.mxu3 %v774_v42  ;;  %v1178_v42 = vld [vmem:[%s1660_s8] ss:$0 sm:$0xff] }
 0x53c   :  { %1144 = vmatmul.msk.f32.vlgmr.msrb.gmra.mxu3 %vm181_vm8, %v771_v43  ;;  %867 = vmatpush.msra.mxu2 %v838_v55 }
 0x542   :  { %v800_v47 = vpop.permute.xlu0 %799 }
 0x543   :  { %820 = vmatpush.msrb.mxu1 %v800_v47 }
 0x544   :  { %1145 = vmatmul.msk.f32.vlgmr.msrb.gmra.mxu1 %vm181_vm8, %v772_v48  ;;  %vm499_vm8 = vcmask 130112  }
 0x5a6   :  { %v462_v50 = vpop.f32.mrf.mxu3 }
 0x5a7   :  { %493 = vrot.lane.b32.xlu1 %v462_v50, %s1307_s17 }
 0x5b0   :  { %v655_v49 = vpop.f32.mrf.mxu1 }
 0x5b1   :  { %662 = vrot.lane.b32.xlu2 %v655_v49, %s1321_s21 }
 0x5b7   :  { %v629_v16 = vpop.f32.mrf.mxu3 }
 0x5b8   :  { %660 = vrot.lane.b32.xlu0 %v629_v16, %s1321_s21  ;;  %v1179_v16 = vld [vmem:[%s1662_s10] ss:$0 sm:$0xff] }
 0x5bf   :  { %v796_v52 = vpop.f32.mrf.mxu3 }
 0x5c0   :  { %495 = vrot.lane.b32.xlu0 %v488_v51, %s1307_s17  ;;  %827 = vrot.lane.b32.xlu1 %v796_v52, %s1322_s22 }
 0x5c1   :  { %v822_v53 = vpop.f32.mrf.mxu1 }
 0x5c8   :  { %829 = vrot.lane.b32.xlu1 %v822_v53, %s1322_s22 }
 0x60b   :  { %v663_v62 = vpop.permute.xlu2 %662 }
 0x619   :  { %v494_v57 = vpop.permute.xlu1 %493 }
 0x61a   :  { %500 = vst.msk [vmem:[#allocation2] sm:$0xff] %vm499_vm8, %v494_v57  ;;  %v1063_v57 = vld [vmem:[%s1663_s11 + $0x38] sm:$0xff] }
 0x61b   :  { %1083 = vmatpush.msra.mxu3 %v1063_v57 }
 0x62a   :  { %v661_v59 = vpop.permute.xlu0 %660 }
 0x62b   :  { %667 = vst.msk [vmem:[#allocation2] sm:$0xff] %vm666_vm13, %v661_v59 }
 0x632   :  { %v496_v60 = vpop.permute.xlu0 %495  ;;  %v828_v61 = vpop.permute.xlu1 %827 }
 0x633   :  { %501 = vst.msk [vmem:[#allocation2 + $0x8] sm:$0xff] %vm499_vm8, %v496_v60  ;;  %vm1068_vm8 = vcmask 523264  }
 0x634   :  { %668 = vst.msk [vmem:[#allocation2 + $0x8] sm:$0xff] %vm666_vm13, %v663_v62  ;;  %v1062_v62 = vld [vmem:[%s1663_s11 + $0x30] sm:$0xff] }
 0x635   :  { %834 = vst.msk [vmem:[#allocation2] sm:$0xff] %vm833_vm14, %v828_v61  ;;  %1084 = vmatpush.msra.mxu3 %v1062_v62 }
 0x63a   :  { %v830_v63 = vpop.permute.xlu1 %829 }
 0x63b   :  { %835 = vst.msk [vmem:[#allocation2 + $0x8] sm:$0xff] %vm833_vm14, %v830_v63 }
 0x63c   :  { %v836_v0 = vld [vmem:[#allocation2] sm:$0xff] }
 0x63d   :  { %1146 = vmatmul.msk.f32.vlgmr.msra.gmra.mxu2 %vm77_vm0, %v836_v0 }
 0x642   :  { %v837_v1 = vld [vmem:[#allocation2 + $0x8] sm:$0xff] }
 0x645   :  { %1147 = vmatmul.msk.f32.gmra.mxu2 %vm77_vm0, %v837_v1 }
 0x6c0   :  { %v869_v3 = vpop.f32.mrf.mxu2 }
 0x6c1   :  { %v870_v4 = vadd.f32 %v1176_v2, %v869_v3 }
 0x6c3   :  { %v875_v5 = vsel %vm77_vm0, %v870_v4, 0.0 }
 0x6c4   :  { %876 = vadd.xlane.f32.xlu0 %v875_v5 }
 0x6c8   :  { %v872_v7 = vpop.f32.mrf.mxu2 }
 0x6c9   :  { %v873_v8 = vadd.f32 %v1176_v2, %v872_v7  ;;  %v1061_v2 = vld [vmem:[%s1663_s11 + $0x28] sm:$0xff]  ;;  %v1060_v7 = vld [vmem:[%s1663_s11 + $0x20] sm:$0xff] }
 0x6ca   :  { %1085 = vmatpush.msra.mxu3 %v1061_v2 }
 0x6cb   :  { %v878_v9 = vsel %vm77_vm0, %v873_v8, 0.0 }
 0x6cc   :  { %879 = vadd.xlane.f32.xlu1 %v878_v9  ;;  %1086 = vmatpush.msra.mxu3 %v1060_v7 }
 0x737   :  { %v877_v11 = vpop.xlane.xlu0 %876 }
 0x738   :  { %v881_v12 = vmul.f32 %v877_v11, %v1405_v10 }
 0x73a   :  { %v883_v13 = vsub.f32 %v870_v4, %v881_v12  ;;  %v1059_v12 = vld [vmem:[%s1663_s11 + $0x18] sm:$0xff] }
 0x73b   :  { %1087 = vmatpush.msra.mxu3 %v1059_v12 }
 0x73c   :  { %v885_v14 = vmul.f32 %v883_v13, %v883_v13 }
 0x73e   :  { %v887_v6 = vsel %vm77_vm0, %v885_v14, 0.0 }
 0x73f   :  { %888 = vadd.xlane.f32.xlu2 %v887_v6  ;;  %v880_v15 = vpop.xlane.xlu1 %879 }
 0x740   :  { %v882_v18 = vmul.f32 %v880_v15, %v1405_v10  ;;  %v1058_v15 = vld [vmem:[%s1663_s11 + $0x10] sm:$0xff] }
 0x741   :  { %1088 = vmatpush.msra.mxu3 %v1058_v15 }
 0x742   :  { %v884_v19 = vsub.f32 %v873_v8, %v882_v18 }
 0x743   :  { %1089 = vmatpush.msra.mxu3 %v1057_v22 }
 0x744   :  { %v886_v20 = vmul.f32 %v884_v19, %v884_v19 }
 0x746   :  { %v890_v21 = vsel %vm77_vm0, %v886_v20, 0.0 }
 0x747   :  { %891 = vadd.xlane.f32.xlu0 %v890_v21 }
 0x7b2   :  { %v889_v27 = vpop.xlane.xlu2 %888 }
 0x7b3   :  { %v893_v28 = vmul.f32 %v889_v27, %v1405_v10  ;;  %v1056_v27 = vld [vmem:[%s1663_s11] sm:$0xff] }
 0x7b4   :  { %1090 = vmatpush.msra.mxu3 %v1056_v27 }
 0x7b5   :  { %v895_v29 = vadd.f32 1e-05, %v893_v28 }
 0x7b7   :  { %1219 = vrsqrt.f32 %v895_v29  ;;  %vm903_vm1 = vweird.f32 %v895_v29 }
 0x7ba   :  { %v892_v30 = vpop.xlane.xlu0 %891 }
 0x7bb   :  { %v894_v31 = vmul.f32 %v892_v30, %v1405_v10 }
 0x7bd   :  { %v1220_v32 = vpop.eup %1219  ;;  %v896_v33 = vadd.f32 1e-05, %v894_v31 }
 0x7be   :  { %v898_v34 = vmul.f32 %v1220_v32, %v895_v29  ;;  %vm904_vm15 = vweird.f32 %v1220_v32 }
 0x7bf   :  { %1221 = vrsqrt.f32 %v896_v33  ;;  %vm905_vm2 = vmor %vm903_vm1, %vm904_vm15  ;;  %vm913_vm4 = vweird.f32 %v896_v33 }
 0x7c0   :  { %v899_v35 = vmul.f32 %v1220_v32, %v898_v34 }
 0x7c2   :  { %v900_v36 = vmul.f32 0.5, %v899_v35 }
 0x7c4   :  { %v901_v37 = vsub.f32 1.5, %v900_v36 }
 0x7c5   :  { %v1222_v38 = vpop.eup %1221 }
 0x7c6   :  { %v902_v39 = vmul.f32 %v1220_v32, %v901_v37  ;;  %v908_v40 = vmul.f32 %v1222_v38, %v896_v33  ;;  %vm914_vm3 = vweird.f32 %v1222_v38 }
 0x7c7   :  { %vm915_vm5 = vmor %vm913_vm4, %vm914_vm3 }
 0x7c8   :  { %v906_v41 = vsel %vm905_vm2, %v1220_v32, %v902_v39  ;;  %v909_v58 = vmul.f32 %v1222_v38, %v908_v40 }
 0x7c9   :  { %v917_v10 = vmul.f32 %v906_v41, %v883_v13 }
 0x7ca   :  { %v910_v43 = vmul.f32 0.5, %v909_v58 }
 0x7cb   :  { %v923_v44 = vmul.f32 %v1177_v24, %v917_v10 }
 0x7cc   :  { %v911_v45 = vsub.f32 1.5, %v910_v43 }
 0x7cd   :  { %v929_v46 = vadd.f32 %v1178_v42, %v923_v44 }
 0x7ce   :  { %v912_v47 = vmul.f32 %v1222_v38, %v911_v45 }
 0x7cf   :  { %1148 = vmatmul.msk.f32.vlgmr.msrb.gmra.mxu0 %vm77_vm0, %v929_v46 }
 0x7d0   :  { %v916_v48 = vsel %vm915_vm5, %v1222_v38, %v912_v47 }
 0x7d1   :  { %v918_v50 = vmul.f32 %v916_v48, %v884_v19 }
 0x7d3   :  { %v924_v51 = vmul.f32 %v1177_v24, %v918_v50 }
 0x7d5   :  { %v930_v49 = vadd.f32 %v1178_v42, %v924_v51 }
 0x7d7   :  { %1149 = vmatmul.msk.f32.gmra.mxu0 %vm77_vm0, %v930_v49 }
 0x84c   :  { %v962_v52 = vpop.f32.mrf.mxu0 }
 0x84d   :  { %v1599_v53 = vadd.f32 %v1179_v16, %v962_v52 }
 0x84f   :  { %v1602_v17 = vmul.f32 0.70710677, %v1599_v53 }
 0x851   :  { %v972_v54 = vmul.f32 %v1602_v17, %v1602_v17 }
 0x853   :  { %v973_v56 = vmin.f32 %v972_v54, 16.0 }
 0x854   :  { %v965_v55 = vpop.f32.mrf.mxu0 }
 0x855   :  { %v974_v59 = vmul.f32 2.1237322e-06, %v973_v56  ;;  %v985_v60 = vmul.f32 3.8918573e-05, %v973_v56  ;;  %v1609_v61 = vadd.f32 %v1179_v16, %v965_v55 }
 0x857   :  { %v975_v63 = vadd.f32 0.00028619796, %v974_v59  ;;  %v986_v0 = vadd.f32 0.001143296, %v985_v60  ;;  %v1615_v1 = vmul.f32 0.70710677, %v1609_v61 }
 0x858   :  { %v969_v15 = vmul.f32 0.5, %v1609_v61 }
 0x859   :  { %v976_v3 = vmul.f32 %v975_v63, %v973_v56  ;;  %v987_v4 = vmul.f32 %v986_v0, %v973_v56  ;;  %v1012_v5 = vmul.f32 %v1615_v1, %v1615_v1 }
 0x85b   :  { %v988_v8 = vadd.f32 0.014752088, %v987_v4  ;;  %v977_v9 = vadd.f32 0.0036580483, %v976_v3  ;;  %v1013_v11 = vmin.f32 %v1012_v5, 16.0  ;;  %v968_v5 = vmul.f32 0.5, %v1599_v53 }
 0x85c   :  { %v1180_v53 = vld [vmem:[%s1664_s12] ss:$0 sm:$0xff] }
 0x85d   :  { %v989_v13 = vmul.f32 %v988_v8, %v973_v56  ;;  %v1014_v14 = vmul.f32 2.1237322e-06, %v1013_v11  ;;  %v1025_v6 = vmul.f32 3.8918573e-05, %v1013_v11  ;;  %v978_v19 = vmul.f32 %v977_v9, %v973_v56 }
 0x85f   :  { %v990_v18 = vadd.f32 0.112945676, %v989_v13  ;;  %v1015_v20 = vadd.f32 0.00028619796, %v1014_v14  ;;  %v1026_v21 = vadd.f32 0.001143296, %v1025_v6 }
 0x860   :  { %v979_v29 = vadd.f32 0.05243302, %v978_v19 }
 0x861   :  { %v991_v23 = vmul.f32 %v990_v18, %v973_v56  ;;  %v1016_v25 = vmul.f32 %v1015_v20, %v1013_v11  ;;  %v1027_v26 = vmul.f32 %v1026_v21, %v1013_v11 }
 0x862   :  { %v980_v35 = vmul.f32 %v979_v29, %v973_v56 }
 0x863   :  { %v992_v28 = vadd.f32 0.4994258, %v991_v23  ;;  %v1028_v30 = vadd.f32 0.014752088, %v1027_v26  ;;  %v1017_v32 = vadd.f32 0.0036580483, %v1016_v25 }
 0x864   :  { %v981_v39 = vadd.f32 0.18741608, %v980_v35 }
 0x865   :  { %v993_v31 = vmul.f32 %v992_v28, %v973_v56  ;;  %v1029_v33 = vmul.f32 %v1028_v30, %v1013_v11  ;;  %v1018_v37 = vmul.f32 %v1017_v32, %v1013_v11 }
 0x866   :  { %v982_v10 = vmul.f32 %v981_v39, %v973_v56 }
 0x867   :  { %v994_v34 = vadd.f32 1.0, %v993_v31  ;;  %v1030_v36 = vadd.f32 0.112945676, %v1029_v33  ;;  %v1019_v24 = vadd.f32 0.05243302, %v1018_v37 }
 0x868   :  { %v983_v47 = vadd.f32 1.1283791, %v982_v10 }
 0x869   :  { %1223 = vrcp.f32 %v994_v34  ;;  %v1031_v38 = vmul.f32 %v1030_v36, %v1013_v11  ;;  %v1020_v44 = vmul.f32 %v1019_v24, %v1013_v11  ;;  %v1006_v46 = vand.u32 2147483648, %v994_v34 }
 0x86a   :  { %v1004_v50 = vand.u32 2147483647, %v994_v34  ;;  %vm1000_vm7 = vweird.f32 %v994_v34  ;;  %v984_v54 = vmul.f32 %v983_v47, %v1602_v17 }
 0x86b   :  { %v1032_v40 = vadd.f32 0.4994258, %v1031_v38  ;;  %v1021_v51 = vadd.f32 0.18741608, %v1020_v44  ;;  %v1007_v16 = vor.u32 1.1754944e-38, %v1006_v46 }
 0x86c   :  { %vm1005_vm10 = vcmp.eq.f32.partialorder %v1004_v50, 8.507059e+37 }
 0x86d   :  { %v1033_v41 = vmul.f32 %v1032_v40, %v1013_v11  ;;  %v1022_v57 = vmul.f32 %v1021_v51, %v1013_v11 }
 0x86f   :  { %v1224_v58 = vpop.eup %1223  ;;  %v1034_v43 = vadd.f32 1.0, %v1033_v41  ;;  %v1023_v2 = vadd.f32 1.1283791, %v1022_v57 }
 0x870   :  { %v996_v42 = vmul.f32 %v1224_v58, %v994_v34  ;;  %vm1001_vm6 = vweird.f32 %v1224_v58 }
 0x871   :  { %1225 = vrcp.f32 %v1034_v43  ;;  %vm1002_vm9 = vmor %vm1000_vm7, %vm1001_vm6  ;;  %v1046_v0 = vand.u32 2147483648, %v1034_v43  ;;  %v1044_v4 = vand.u32 2147483647, %v1034_v43  ;;  %vm1040_vm12 = vweird.f32 %v1034_v43 }
 0x872   :  { %v997_v45 = vsub.f32 1.0, %v996_v42  ;;  %v1024_v11 = vmul.f32 %v1023_v2, %v1615_v1 }
 0x873   :  { %v1047_v9 = vor.u32 1.1754944e-38, %v1046_v0  ;;  %vm1045_vm14 = vcmp.eq.f32.partialorder %v1044_v4, 8.507059e+37 }
 0x874   :  { %v998_v48 = vmul.f32 %v1224_v58, %v997_v45 }
 0x876   :  { %v999_v49 = vadd.f32 %v1224_v58, %v998_v48 }
 0x877   :  { %v1226_v52 = vpop.eup %1225 }
 0x878   :  { %v1003_v55 = vsel %vm1002_vm9, %v1224_v58, %v999_v49  ;;  %v1036_v59 = vmul.f32 %v1226_v52, %v1034_v43  ;;  %vm1041_vm11 = vweird.f32 %v1226_v52 }
 0x879   :  { %v1008_v56 = vsel %vm1005_vm10, %v1007_v16, %v1003_v55  ;;  %vm1042_vm13 = vmor %vm1040_vm12, %vm1041_vm11 }
 0x87a   :  { %v1009_v60 = vmul.f32 %v1008_v56, %v984_v54  ;;  %v1037_v62 = vsub.f32 1.0, %v1036_v59 }
 0x87c   :  { %v1150_v63 = vclamps-f32 %v1009_v60, 1.0  ;;  %v1038_v3 = vmul.f32 %v1226_v52, %v1037_v62 }
 0x87e   :  { %v1052_v7 = vadd.f32 1.0, %v1150_v63  ;;  %v1039_v8 = vadd.f32 %v1226_v52, %v1038_v3 }
 0x880   :  { %v1054_v17 = vmul.f32 %v1052_v7, %v968_v5  ;;  %v1043_v12 = vsel %vm1042_vm13, %v1226_v52, %v1039_v8 }
 0x881   :  { %v1048_v13 = vsel %vm1045_vm14, %v1047_v9, %v1043_v12 }
 0x882   :  { %1152 = vmatmul.msk.f32.vlgmr.msra.gmra.mxu3 %vm1068_vm8, %v1054_v17  ;;  %v1049_v14 = vmul.f32 %v1048_v13, %v1024_v11 }
 0x884   :  { %v1151_v6 = vclamps-f32 %v1049_v14, 1.0 }
 0x886   :  { %v1053_v18 = vadd.f32 1.0, %v1151_v6 }
 0x888   :  { %v1055_v19 = vmul.f32 %v1053_v18, %v969_v15 }
 0x88a   :  { %1153 = vmatmul.msk.f32.gmra.mxu3 %vm1068_vm8, %v1055_v19 }
 0x905   :  { %v1092_v20 = vpop.f32.mrf.mxu3 }
 0x906   :  { %v1093_v21 = vadd.f32 %v1180_v53, %v1092_v20 }
 0x908   :  { %1098 = vst.msk [vmem:[#allocation8] sm:$0xff] %vm77_vm0, %v1093_v21 }
 0x90d   :  { %v1095_v1 = vpop.f32.mrf.mxu3 }
 0x90e   :  { %v1096_v22 = vadd.f32 %v1180_v53, %v1095_v1 }
 0x910   :  { %1099 = vst.msk [vmem:[#allocation8 + $0x8] sm:$0xff] %vm77_vm0, %v1096_v22 }
 0x911   :  { %1112 = dma.vmem_to_hbm [thread:$0]  %s1105_s19, 256, %s1107_s1, [#allocation5], %s1306_s16, %s1306_s16, %s1307_s17  }
 0x912   :  { %1303 = dma.done.wait [#allocation5], 256  }
 0x913   :  { %1304 = vsyncadd [#allocation5], 4294967040 }
 0x914   :  { %1117 = vsyncpa [#allocation4], 1 }
 0x915   :  { %1118 = vsyncpa [#allocation7], 1 }
 0x916   :  { %1119 = vsyncpa [#allocation5], 1 }

</bundles_post_ra>
